<compile_context>
chip_gen: v7x
topology: tpu7x:2x2x1
jax: 0.10.0
libtpu: 0.0.40
codegen_flags: <defaults>
</compile_context>

<pallas_src>
import math

import jax
import jax.numpy as jnp
from jax.experimental import pallas as pl
from jax.experimental.pallas import tpu as pltpu


# ----------------------------- glue (plain JAX) -----------------------------

def build_decay_gammas(num_heads):
    xmin, xmax = math.log(1 / 32), math.log(1 / 512)
    x = jnp.linspace(xmin, xmax, num_heads, dtype=jnp.float32)
    return 1.0 - jnp.exp(x)


def xpos_half_factors(length, head_dim, downscale, scale_base=512.0):
    """Half-width XPOS factors: cos*scale, sin*scale, each (length, head_dim//2)."""
    half = head_dim // 2
    scale = (jnp.arange(0, head_dim, 2, dtype=jnp.float32) + 0.4 * head_dim) / (1.4 * head_dim)
    pos = jnp.arange(length, dtype=jnp.float32)
    scale_m = scale[None, :] ** (pos / scale_base)[:, None]          # (L, half)
    if downscale:
        scale_m = 1.0 / scale_m
    inv_freq = 1.0 / (10000.0 ** (jnp.arange(half, dtype=jnp.float32) / half))
    sinusoid = pos[:, None] * inv_freq[None, :]
    return jnp.cos(sinusoid) * scale_m, jnp.sin(sinusoid) * scale_m


def build_params(key, hidden_size, heads, double_v_dim=False):
    head_size = hidden_size // heads
    head_v_dim = head_size * 2 if double_v_dim else head_size
    v_dim = heads * head_v_dim
    k1, k2, k3, k4, k5 = jax.random.split(key, 5)
    return dict(
        hidden_size=hidden_size,
        heads=heads,
        head_size=head_size,
        head_v_dim=head_v_dim,
        v_dim=v_dim,
        W_Q=jax.random.normal(k1, (heads, hidden_size, head_size), jnp.float32) / hidden_size,
        W_K=jax.random.normal(k2, (heads, hidden_size, head_size), jnp.float32) / hidden_size,
        W_V=jax.random.normal(k3, (heads, hidden_size, head_v_dim), jnp.float32) / hidden_size,
        W_G=jax.random.normal(k4, (hidden_size, v_dim), jnp.float32) / hidden_size,
        W_O=jax.random.normal(k5, (v_dim, hidden_size), jnp.float32) / hidden_size,
        gammas=build_decay_gammas(heads),
        gn_weight=jnp.ones((v_dim,), jnp.float32),
        gn_bias=jnp.zeros((v_dim,), jnp.float32),
    )


def _choose_l_tile(L, max_tile=256):
    if L <= max_tile:
        return L
    for t in (max_tile, 128, 64, 32, 16, 8):
        if L % t == 0:
            return t
    return L


# ------------------------------- Pallas kernel -------------------------------

def _retention_kernel(x_ref, mem_ref, wq_ref, wk_ref, wv_ref, wg_ref, wo_ref,
                      qcos_ref, qsin_ref, kcos_ref, ksin_ref, lg_ref,
                      gnw_ref, gnb_ref, o_ref, k_scr, v_scr):
    f32, bf16 = jnp.float32, jnp.bfloat16
    _, TL, D = x_ref.shape
    _, K, _ = mem_ref.shape
    heads, _, hs = wq_ref.shape
    half = hs // 2

    # XPOS rotation in the half-split layout: y = x*cos + halfswap(x)*sin_signed
    # (sign already folded into the host-precomputed sin factors; off the MXU).
    def halfswap(t):
        return jnp.concatenate([t[..., half:], t[..., :half]], axis=-1)

    li = pl.program_id(1)

    # --- memory-side projections: compute once per batch element, cache in VMEM ---
    @pl.when(li == 0)
    def _():
        mem = mem_ref[0]                                       # (K, D) bf16
        mb = jnp.broadcast_to(mem[None], (heads, K, D))
        k = jnp.einsum('hkd,hds->hks', mb, wk_ref[...], preferred_element_type=f32)
        v = jnp.einsum('hkd,hdv->hkv', mb, wv_ref[...], preferred_element_type=f32)
        k = k * kcos_ref[...][None] + halfswap(k) * ksin_ref[...][None]
        k_scr[...] = k.astype(bf16)                            # (H, K, hs)
        v_scr[...] = v.astype(bf16)                            # (H, K, hv)

    # --- query-side projections (per L-tile), heads batched on the MXU ---
    x = x_ref[0]                                               # (TL, D) bf16
    xb = jnp.broadcast_to(x[None], (heads, TL, D))
    q = jnp.einsum('hld,hds->hls', xb, wq_ref[...], preferred_element_type=f32)
    q = q * qcos_ref[...][None] + halfswap(q) * qsin_ref[...][None]

    # retention scores, heads batched (bf16 operands, f32 accumulation)
    s = jnp.einsum('hls,hks->hlk', q.astype(bf16), k_scr[...],
                   preferred_element_type=f32)                 # (H, TL, K)

    # decay mask generated in-kernel (no (H, L, K) HBM traffic)
    l_off = li * TL
    qpos = jax.lax.broadcasted_iota(jnp.int32, (TL, K), 0) + l_off
    kpos = jax.lax.broadcasted_iota(jnp.int32, (TL, K), 1)
    dist = jnp.abs(qpos - kpos).astype(f32)
    decay = jnp.exp(dist[None] * lg_ref[...])                  # gamma**dist  (H, TL, K)
    decay = jnp.where((kpos > qpos)[None], 0.0, decay)         # gamma**inf == 0
    s = s * decay

    # decayed scores @ V, heads batched
    r = jnp.einsum('hlk,hkv->hlv', s.astype(bf16), v_scr[...],
                   preferred_element_type=f32)                 # (H, TL, hv)

    # GroupNorm(heads, v_dim): per-(position, head) normalization over hv (f32)
    mean = jnp.mean(r, axis=-1, keepdims=True)
    var = jnp.mean(jnp.square(r - mean), axis=-1, keepdims=True)
    rn = (r - mean) * jax.lax.rsqrt(var + 1e-5)
    rn = rn * gnw_ref[...] + gnb_ref[...]                      # (H, 1, hv) affine

    # SiLU gate, head-batched (same (H, TL, hv) layout; no transposes)
    g = jnp.einsum('hld,hdv->hlv', xb, wg_ref[...], preferred_element_type=f32)
    gated = (g * jax.nn.sigmoid(g)) * rn                       # (H, TL, hv) f32

    # output projection: batched per-head (TL,hv)@(hv,D), then reduce over heads
    out3 = jnp.einsum('hlv,hvd->hld', gated.astype(bf16), wo_ref[...],
                      preferred_element_type=f32)              # (H, TL, D)
    o_ref[0] = jnp.sum(out3, axis=0).astype(o_ref.dtype)


def _const_spec(shape):
    zeros = (0,) * len(shape)
    return pl.BlockSpec(shape, lambda b, li: zeros)


def multi_scale_decoder_retention(X, Mem, p, max_l_tile=256):
    B, L, D = X.shape
    _, K, _ = Mem.shape
    H, hs, hv = p["heads"], p["head_size"], p["head_v_dim"]
    TL = _choose_l_tile(L, max_l_tile)
    bf16 = jnp.bfloat16

    # half-split (RoPE-style) column permutation for Q/K; scores are invariant
    # to a consistent permutation of q and k columns within each head.
    perm = jnp.concatenate([jnp.arange(0, hs, 2), jnp.arange(1, hs, 2)])
    wq = p["W_Q"][:, :, perm].astype(bf16)                                     # (H,D,hs)
    wk = p["W_K"][:, :, perm].astype(bf16)                                     # (H,D,hs)
    wv = p["W_V"].astype(bf16)                                                 # (H,D,hv)
    wg = jnp.transpose(p["W_G"].reshape(D, H, hv), (1, 0, 2)).astype(bf16)     # (H,D,hv)
    wo = p["W_O"].reshape(H, hv, D).astype(bf16)                               # (H,hv,D)

    # XPOS factors in the half-split layout, sign folded into sin
    qc, qs = xpos_half_factors(L, hs, downscale=False)
    kc, ks = xpos_half_factors(K, hs, downscale=True)
    qcos = jnp.concatenate([qc, qc], axis=-1)              # (L, hs)
    qsin = jnp.concatenate([-qs, qs], axis=-1)
    kcos = jnp.concatenate([kc, kc], axis=-1)              # (K, hs)
    ksin = jnp.concatenate([-ks, ks], axis=-1)

    log_g = jnp.log(p["gammas"]).reshape(H, 1, 1).astype(jnp.float32)
    gnw = p["gn_weight"].reshape(H, 1, hv).astype(jnp.float32)
    gnb = p["gn_bias"].reshape(H, 1, hv).astype(jnp.float32)

    Xb = X.astype(bf16)
    Mb = Mem.astype(bf16)

    grid = (B, L // TL)
    return pl.pallas_call(
        _retention_kernel,
        out_shape=jax.ShapeDtypeStruct((B, L, D), jnp.float32),
        grid=grid,
        in_specs=[
            pl.BlockSpec((1, TL, D), lambda b, li: (b, li, 0)),   # X (bf16)
            pl.BlockSpec((1, K, D), lambda b, li: (b, 0, 0)),     # Mem (bf16)
            _const_spec((H, D, hs)),                              # W_Q (half-split cols)
            _const_spec((H, D, hs)),                              # W_K (half-split cols)
            _const_spec((H, D, hv)),                              # W_V
            _const_spec((H, D, hv)),                              # W_G per head
            _const_spec((H, hv, D)),                              # W_O per head
            pl.BlockSpec((TL, hs), lambda b, li: (li, 0)),        # q cos
            pl.BlockSpec((TL, hs), lambda b, li: (li, 0)),        # q sin (signed)
            _const_spec((K, hs)),                                 # k cos
            _const_spec((K, hs)),                                 # k sin (signed)
            _const_spec((H, 1, 1)),                               # log gammas
            _const_spec((H, 1, hv)),                              # group-norm weight
            _const_spec((H, 1, hv)),                              # group-norm bias
        ],
        out_specs=pl.BlockSpec((1, TL, D), lambda b, li: (b, li, 0)),
        scratch_shapes=[
            pltpu.VMEM((H, K, hs), bf16),   # cached XPOS'd K projection (per batch)
            pltpu.VMEM((H, K, hv), bf16),   # cached V projection (per batch)
        ],
        compiler_params=pltpu.CompilerParams(
            # L-tile axis must be sequential per batch so the K/V cache computed
            # at li==0 is valid for li>0; batch axis is megacore-parallel.
            dimension_semantics=("parallel", "arbitrary")),
    )(Xb, Mb, wq, wk, wv, wg, wo, qcos, qsin, kcos, ksin, log_g, gnw, gnb)
    # TODO(synk): add a K-tile grid axis ("arbitrary") with an f32 VMEM accumulator
    # for very long memories (keeps the (H, TL, K) score tile bounded); K is kept
    # resident here.


# ------------------------- pure-JAX reference (check) -------------------------

def reference_forward(X, Mem, p):
    B, L, D = X.shape
    _, K, _ = Mem.shape
    heads, hs, hv, v_dim = p["heads"], p["head_size"], p["head_v_dim"], p["v_dim"]

    q = jnp.einsum("bld,ndh->bnlh", X, p["W_Q"])
    k = jnp.einsum("bld,ndh->bnlh", Mem, p["W_K"])
    v = jnp.einsum("bld,ndv->bnlv", Mem, p["W_V"])

    def rot_every_two(x):
        x1, x2 = x[..., ::2], x[..., 1::2]
        return jnp.stack((-x2, x1), axis=-1).reshape(x.shape)

    qc, qs = xpos_half_factors(L, hs, downscale=False)
    kc, ks = xpos_half_factors(K, hs, downscale=True)
    dup = lambda m: jnp.repeat(m, 2, axis=-1)
    q = q * dup(qc) + rot_every_two(q) * dup(qs)
    k = k * dup(kc) + rot_every_two(k) * dup(ks)

    qpos = jnp.arange(L, dtype=jnp.float32)
    kpos = jnp.arange(K, dtype=jnp.float32)
    dist = jnp.abs(qpos[:, None] - kpos[None, :])
    future = kpos[None, :] > qpos[:, None]
    decay = p["gammas"][:, None, None] ** dist[None]
    decay = jnp.where(future[None], 0.0, decay)                     # (H, L, K)

    ret = jnp.einsum("bnlh,bnkh->bnlk", q, k) * decay[None]
    ret = jnp.einsum("bnlk,bnkv->bnlv", ret, v)                     # (B, H, L, hv)
    ret = jnp.transpose(ret, (0, 2, 1, 3)).reshape(B, L, v_dim)

    r = ret.reshape(B, L, heads, hv)
    mean = jnp.mean(r, axis=-1, keepdims=True)
    var = jnp.mean(jnp.square(r - mean), axis=-1, keepdims=True)
    r = (r - mean) / jnp.sqrt(var + 1e-5)
    r = r * p["gn_weight"].reshape(1, 1, heads, hv) + p["gn_bias"].reshape(1, 1, heads, hv)
    ret = r.reshape(B, L, v_dim)

    g = X @ p["W_G"]
    gate = g * jax.nn.sigmoid(g)
    return (gate * ret) @ p["W_O"]


# ----------------------------------- main ------------------------------------

if __name__ == "__main__":
    key = jax.random.PRNGKey(0)
    B, L, K, hidden, heads = 2, 8, 8, 32, 4
    kx, km, kp = jax.random.split(key, 3)
    X = jax.random.normal(kx, (B, L, hidden), jnp.float32)
    Mem = jax.random.normal(km, (B, K, hidden), jnp.float32)
    params = build_params(kp, hidden, heads, double_v_dim=False)

    out = multi_scale_decoder_retention(X, Mem, params)
    out = jax.block_until_ready(out)

    ref = reference_forward(X, Mem, params)
    assert out.shape == (B, L, hidden)
    assert bool(jnp.all(jnp.isfinite(out)))
    # bf16 MXU operands -> compare in relative error against the f32 reference
    err = float(jnp.max(jnp.abs(out - ref)))
    scale = float(jnp.max(jnp.abs(ref))) + 1e-8
    assert err / scale < 0.08, f"rel err {err / scale}"
    print("KERNEL_OK")
</pallas_src>

<mosaic_0001>
module attributes {stable_mosaic.version = 11 : i64} {
  func.func @_retention_kernel(%arg0: i32, %arg1: i32, %arg2: memref<1x8x32xbf16, #tpu.memory_space<vmem>>, %arg3: memref<1x8x32xbf16, #tpu.memory_space<vmem>>, %arg4: memref<4x32x8xbf16, #tpu.memory_space<vmem>>, %arg5: memref<4x32x8xbf16, #tpu.memory_space<vmem>>, %arg6: memref<4x32x8xbf16, #tpu.memory_space<vmem>>, %arg7: memref<4x32x8xbf16, #tpu.memory_space<vmem>>, %arg8: memref<4x8x32xbf16, #tpu.memory_space<vmem>>, %arg9: memref<8x8xf32, #tpu.memory_space<vmem>>, %arg10: memref<8x8xf32, #tpu.memory_space<vmem>>, %arg11: memref<8x8xf32, #tpu.memory_space<vmem>>, %arg12: memref<8x8xf32, #tpu.memory_space<vmem>>, %arg13: memref<4x1x1xf32, #tpu.memory_space<vmem>>, %arg14: memref<4x1x8xf32, #tpu.memory_space<vmem>>, %arg15: memref<4x1x8xf32, #tpu.memory_space<vmem>>, %arg16: memref<1x8x32xf32, #tpu.memory_space<vmem>>, %arg17: memref<4x8x8xbf16, #tpu.memory_space<vmem>>, %arg18: memref<4x8x8xbf16, #tpu.memory_space<vmem>>) attributes {dimension_semantics = [#tpu.dimension_semantics<parallel>, #tpu.dimension_semantics<arbitrary>], iteration_bounds = array<i64: 2, 1>, scalar_prefetch = 0 : i64, scratch_operands = 2 : i64, tpu.core_type = #tpu.core_type<tc>, window_params = [{transform_indices = @transform_0, window_bounds = array<i64: 1, 8, 32>}, {transform_indices = @transform_1, window_bounds = array<i64: 1, 8, 32>}, {pipeline_mode = #tpu.pipeline_mode<synchronous>, transform_indices = @transform_2, window_bounds = array<i64: 4, 32, 8>}, {pipeline_mode = #tpu.pipeline_mode<synchronous>, transform_indices = @transform_3, window_bounds = array<i64: 4, 32, 8>}, {pipeline_mode = #tpu.pipeline_mode<synchronous>, transform_indices = @transform_4, window_bounds = array<i64: 4, 32, 8>}, {pipeline_mode = #tpu.pipeline_mode<synchronous>, transform_indices = @transform_5, window_bounds = array<i64: 4, 32, 8>}, {pipeline_mode = #tpu.pipeline_mode<synchronous>, transform_indices = @transform_6, window_bounds = array<i64: 4, 8, 32>}, {transform_indices = @transform_7, window_bounds = array<i64: 8, 8>}, {transform_indices = @transform_8, window_bounds = array<i64: 8, 8>}, {pipeline_mode = #tpu.pipeline_mode<synchronous>, transform_indices = @transform_9, window_bounds = array<i64: 8, 8>}, {pipeline_mode = #tpu.pipeline_mode<synchronous>, transform_indices = @transform_10, window_bounds = array<i64: 8, 8>}, {pipeline_mode = #tpu.pipeline_mode<synchronous>, transform_indices = @transform_11, window_bounds = array<i64: 4, 1, 1>}, {pipeline_mode = #tpu.pipeline_mode<synchronous>, transform_indices = @transform_12, window_bounds = array<i64: 4, 1, 8>}, {pipeline_mode = #tpu.pipeline_mode<synchronous>, transform_indices = @transform_13, window_bounds = array<i64: 4, 1, 8>}, {transform_indices = @transform_14, window_bounds = array<i64: 1, 8, 32>}]} {
    %c0_i32 = arith.constant 0 : i32
    %0 = arith.cmpi eq, %arg1, %c0_i32 : i32
    %1 = arith.extui %0 : i1 to i32
    %c0_i32_0 = arith.constant 0 : i32
    %2 = arith.cmpi ne, %1, %c0_i32_0 : i32
    scf.if %2 {
      %c0_46 = arith.constant 0 : index
      %c0_47 = arith.constant 0 : index
      %c0_48 = arith.constant 0 : index
      %89 = vector.load %arg3[%c0_46, %c0_47, %c0_48] : memref<1x8x32xbf16, #tpu.memory_space<vmem>>, vector<1x8x32xbf16>
      %90 = vector.shape_cast %89 : vector<1x8x32xbf16> to vector<8x32xbf16>
      %91 = vector.shape_cast %90 : vector<8x32xbf16> to vector<1x8x32xbf16>
      %92 = vector.shape_cast %91 : vector<1x8x32xbf16> to vector<1x8x32xbf16>
      %93 = vector.broadcast %92 : vector<1x8x32xbf16> to vector<4x8x32xbf16>
      %c0_49 = arith.constant 0 : index
      %c0_50 = arith.constant 0 : index
      %c0_51 = arith.constant 0 : index
      %94 = vector.load %arg5[%c0_49, %c0_50, %c0_51] : memref<4x32x8xbf16, #tpu.memory_space<vmem>>, vector<4x32x8xbf16>
      "tpu.trace_start"() <{level = 10 : i32, message = "hkd,hds->hks"}> : () -> ()
      %cst_52 = arith.constant dense<0.000000e+00> : vector<4x8x8xf32>
      %95 = tpu.matmul %93, %94, %cst_52 {dimension_numbers = #tpu.dot_dimension_numbers<[2], [1], [1], [2], [0, 0, 0, 1, 1, 2], [0], [0]>} : vector<4x8x32xbf16>, vector<4x32x8xbf16>, vector<4x8x8xf32> -> vector<4x8x8xf32>
      "tpu.trace_stop"() : () -> ()
      %c0_53 = arith.constant 0 : index
      %c0_54 = arith.constant 0 : index
      %c0_55 = arith.constant 0 : index
      %96 = vector.load %arg6[%c0_53, %c0_54, %c0_55] : memref<4x32x8xbf16, #tpu.memory_space<vmem>>, vector<4x32x8xbf16>
      "tpu.trace_start"() <{level = 10 : i32, message = "hkd,hdv->hkv"}> : () -> ()
      %cst_56 = arith.constant dense<0.000000e+00> : vector<4x8x8xf32>
      %97 = tpu.matmul %93, %96, %cst_56 {dimension_numbers = #tpu.dot_dimension_numbers<[2], [1], [1], [2], [0, 0, 0, 1, 1, 2], [0], [0]>} : vector<4x8x32xbf16>, vector<4x32x8xbf16>, vector<4x8x8xf32> -> vector<4x8x8xf32>
      "tpu.trace_stop"() : () -> ()
      %c0_57 = arith.constant 0 : index
      %c0_58 = arith.constant 0 : index
      %98 = vector.load %arg11[%c0_57, %c0_58] : memref<8x8xf32, #tpu.memory_space<vmem>>, vector<8x8xf32>
      %99 = vector.shape_cast %98 : vector<8x8xf32> to vector<1x8x8xf32>
      %100 = vector.broadcast %99 : vector<1x8x8xf32> to vector<4x8x8xf32>
      %101 = arith.mulf %95, %100 : vector<4x8x8xf32>
      %102 = vector.extract_strided_slice %95 {offsets = [0, 0, 4], sizes = [4, 8, 4], strides = [1, 1, 1]} : vector<4x8x8xf32> to vector<4x8x4xf32>
      %103 = vector.extract_strided_slice %95 {offsets = [0, 0, 0], sizes = [4, 8, 4], strides = [1, 1, 1]} : vector<4x8x8xf32> to vector<4x8x4xf32>
      %104 = tpu.concatenate %102, %103 in 2 : vector<4x8x4xf32>, vector<4x8x4xf32> -> vector<4x8x8xf32>
      %c0_59 = arith.constant 0 : index
      %c0_60 = arith.constant 0 : index
      %105 = vector.load %arg12[%c0_59, %c0_60] : memref<8x8xf32, #tpu.memory_space<vmem>>, vector<8x8xf32>
      %106 = vector.shape_cast %105 : vector<8x8xf32> to vector<1x8x8xf32>
      %107 = vector.broadcast %106 : vector<1x8x8xf32> to vector<4x8x8xf32>
      %108 = arith.mulf %104, %107 : vector<4x8x8xf32>
      %109 = arith.addf %101, %108 : vector<4x8x8xf32>
      %110 = arith.truncf %109 : vector<4x8x8xf32> to vector<4x8x8xbf16>
      %c0_61 = arith.constant 0 : index
      %c0_62 = arith.constant 0 : index
      %c0_63 = arith.constant 0 : index
      %111 = vector.load %arg17[%c0_61, %c0_62, %c0_63] : memref<4x8x8xbf16, #tpu.memory_space<vmem>>, vector<4x8x8xbf16>
      tpu.vector_store %arg17[%c0_61, %c0_62, %c0_63], %110 {strides = array<i32>} : memref<4x8x8xbf16, #tpu.memory_space<vmem>>, vector<4x8x8xbf16>,
      %112 = arith.truncf %97 : vector<4x8x8xf32> to vector<4x8x8xbf16>
      %c0_64 = arith.constant 0 : index
      %c0_65 = arith.constant 0 : index
      %c0_66 = arith.constant 0 : index
      %113 = vector.load %arg18[%c0_64, %c0_65, %c0_66] : memref<4x8x8xbf16, #tpu.memory_space<vmem>>, vector<4x8x8xbf16>
      tpu.vector_store %arg18[%c0_64, %c0_65, %c0_66], %112 {strides = array<i32>} : memref<4x8x8xbf16, #tpu.memory_space<vmem>>, vector<4x8x8xbf16>,
    } else {
    }
    %c0 = arith.constant 0 : index
    %c0_1 = arith.constant 0 : index
    %c0_2 = arith.constant 0 : index
    %3 = vector.load %arg2[%c0, %c0_1, %c0_2] : memref<1x8x32xbf16, #tpu.memory_space<vmem>>, vector<1x8x32xbf16>
    %4 = vector.shape_cast %3 : vector<1x8x32xbf16> to vector<8x32xbf16>
    %5 = vector.shape_cast %4 : vector<8x32xbf16> to vector<1x8x32xbf16>
    %6 = vector.shape_cast %5 : vector<1x8x32xbf16> to vector<1x8x32xbf16>
    %7 = vector.broadcast %6 : vector<1x8x32xbf16> to vector<4x8x32xbf16>
    %c0_3 = arith.constant 0 : index
    %c0_4 = arith.constant 0 : index
    %c0_5 = arith.constant 0 : index
    %8 = vector.load %arg4[%c0_3, %c0_4, %c0_5] : memref<4x32x8xbf16, #tpu.memory_space<vmem>>, vector<4x32x8xbf16>
    "tpu.trace_start"() <{level = 10 : i32, message = "hld,hds->hls"}> : () -> ()
    %cst = arith.constant dense<0.000000e+00> : vector<4x8x8xf32>
    %9 = tpu.matmul %7, %8, %cst {dimension_numbers = #tpu.dot_dimension_numbers<[2], [1], [1], [2], [0, 0, 0, 1, 1, 2], [0], [0]>} : vector<4x8x32xbf16>, vector<4x32x8xbf16>, vector<4x8x8xf32> -> vector<4x8x8xf32>
    "tpu.trace_stop"() : () -> ()
    %c0_6 = arith.constant 0 : index
    %c0_7 = arith.constant 0 : index
    %10 = vector.load %arg9[%c0_6, %c0_7] : memref<8x8xf32, #tpu.memory_space<vmem>>, vector<8x8xf32>
    %11 = vector.shape_cast %10 : vector<8x8xf32> to vector<1x8x8xf32>
    %12 = vector.broadcast %11 : vector<1x8x8xf32> to vector<4x8x8xf32>
    %13 = arith.mulf %9, %12 : vector<4x8x8xf32>
    %14 = vector.extract_strided_slice %9 {offsets = [0, 0, 4], sizes = [4, 8, 4], strides = [1, 1, 1]} : vector<4x8x8xf32> to vector<4x8x4xf32>
    %15 = vector.extract_strided_slice %9 {offsets = [0, 0, 0], sizes = [4, 8, 4], strides = [1, 1, 1]} : vector<4x8x8xf32> to vector<4x8x4xf32>
    %16 = tpu.concatenate %14, %15 in 2 : vector<4x8x4xf32>, vector<4x8x4xf32> -> vector<4x8x8xf32>
    %c0_8 = arith.constant 0 : index
    %c0_9 = arith.constant 0 : index
    %17 = vector.load %arg10[%c0_8, %c0_9] : memref<8x8xf32, #tpu.memory_space<vmem>>, vector<8x8xf32>
    %18 = vector.shape_cast %17 : vector<8x8xf32> to vector<1x8x8xf32>
    %19 = vector.broadcast %18 : vector<1x8x8xf32> to vector<4x8x8xf32>
    %20 = arith.mulf %16, %19 : vector<4x8x8xf32>
    %21 = arith.addf %13, %20 : vector<4x8x8xf32>
    %22 = arith.truncf %21 : vector<4x8x8xf32> to vector<4x8x8xbf16>
    %c0_10 = arith.constant 0 : index
    %c0_11 = arith.constant 0 : index
    %c0_12 = arith.constant 0 : index
    %23 = vector.load %arg17[%c0_10, %c0_11, %c0_12] : memref<4x8x8xbf16, #tpu.memory_space<vmem>>, vector<4x8x8xbf16>
    "tpu.trace_start"() <{level = 10 : i32, message = "hls,hks->hlk"}> : () -> ()
    %cst_13 = arith.constant dense<0.000000e+00> : vector<4x8x8xf32>
    %24 = tpu.matmul %22, %23, %cst_13 {dimension_numbers = #tpu.dot_dimension_numbers<[2], [2], [1], [1], [0, 0, 0, 1, 1, 1], [0], [0]>} : vector<4x8x8xbf16>, vector<4x8x8xbf16>, vector<4x8x8xf32> -> vector<4x8x8xf32>
    "tpu.trace_stop"() : () -> ()
    %c8_i32 = arith.constant 8 : i32
    %25 = arith.muli %arg1, %c8_i32 : i32
    %26 = tpu.iota {dimensions = array<i32: 0>} : vector<8x8xi32>
    %27 = vector.broadcast %25 : i32 to vector<8x8xi32>
    %28 = arith.addi %26, %27 : vector<8x8xi32>
    %29 = tpu.iota {dimensions = array<i32: 1>} : vector<8x8xi32>
    %30 = arith.subi %28, %29 : vector<8x8xi32>
    %31 = math.absi %30 : vector<8x8xi32>
    %32 = arith.sitofp %31 : vector<8x8xi32> to vector<8x8xf32>
    %33 = vector.shape_cast %32 : vector<8x8xf32> to vector<1x8x8xf32>
    %c0_14 = arith.constant 0 : index
    %c0_15 = arith.constant 0 : index
    %c0_16 = arith.constant 0 : index
    %34 = vector.load %arg13[%c0_14, %c0_15, %c0_16] : memref<4x1x1xf32, #tpu.memory_space<vmem>>, vector<4x1x1xf32>
    %35 = vector.broadcast %33 : vector<1x8x8xf32> to vector<4x8x8xf32>
    %36 = vector.broadcast %34 : vector<4x1x1xf32> to vector<4x8x8xf32>
    %37 = arith.mulf %35, %36 : vector<4x8x8xf32>
    %38 = math.exp %37 : vector<4x8x8xf32>
    %39 = arith.cmpi sgt, %29, %28 : vector<8x8xi32>
    %40 = vector.shape_cast %39 : vector<8x8xi1> to vector<1x8x8xi1>
    %cst_17 = arith.constant 0.000000e+00 : f32
    %41 = vector.shape_cast %40 : vector<1x8x8xi1> to vector<1x8x8xi1>
    %42 = vector.broadcast %41 : vector<1x8x8xi1> to vector<4x8x8xi1>
    %43 = vector.broadcast %cst_17 : f32 to vector<4x8x8xf32>
    %44 = arith.select %42, %43, %38 : vector<4x8x8xi1>, vector<4x8x8xf32>
    %45 = arith.mulf %24, %44 : vector<4x8x8xf32>
    %46 = arith.truncf %45 : vector<4x8x8xf32> to vector<4x8x8xbf16>
    %c0_18 = arith.constant 0 : index
    %c0_19 = arith.constant 0 : index
    %c0_20 = arith.constant 0 : index
    %47 = vector.load %arg18[%c0_18, %c0_19, %c0_20] : memref<4x8x8xbf16, #tpu.memory_space<vmem>>, vector<4x8x8xbf16>
    "tpu.trace_start"() <{level = 10 : i32, message = "hlk,hkv->hlv"}> : () -> ()
    %cst_21 = arith.constant dense<0.000000e+00> : vector<4x8x8xf32>
    %48 = tpu.matmul %46, %47, %cst_21 {dimension_numbers = #tpu.dot_dimension_numbers<[2], [1], [1], [2], [0, 0, 0, 1, 1, 2], [0], [0]>} : vector<4x8x8xbf16>, vector<4x8x8xbf16>, vector<4x8x8xf32> -> vector<4x8x8xf32>
    "tpu.trace_stop"() : () -> ()
    %cst_22 = arith.constant dense<0.000000e+00> : vector<4x8xf32>
    %49 = vector.multi_reduction <add>, %48, %cst_22 [2] : vector<4x8x8xf32> to vector<4x8xf32>
    %50 = vector.shape_cast %49 : vector<4x8xf32> to vector<4x8x1xf32>
    %cst_23 = arith.constant 8.000000e+00 : f32
    %51 = vector.broadcast %cst_23 : f32 to vector<4x8x1xf32>
    %52 = arith.divf %50, %51 : vector<4x8x1xf32>
    %53 = vector.broadcast %52 : vector<4x8x1xf32> to vector<4x8x8xf32>
    %54 = arith.subf %48, %53 : vector<4x8x8xf32>
    %55 = arith.mulf %54, %54 : vector<4x8x8xf32>
    %cst_24 = arith.constant dense<0.000000e+00> : vector<4x8xf32>
    %56 = vector.multi_reduction <add>, %55, %cst_24 [2] : vector<4x8x8xf32> to vector<4x8xf32>
    %57 = vector.shape_cast %56 : vector<4x8xf32> to vector<4x8x1xf32>
    %cst_25 = arith.constant 8.000000e+00 : f32
    %58 = vector.broadcast %cst_25 : f32 to vector<4x8x1xf32>
    %59 = arith.divf %57, %58 : vector<4x8x1xf32>
    %60 = vector.broadcast %52 : vector<4x8x1xf32> to vector<4x8x8xf32>
    %61 = arith.subf %48, %60 : vector<4x8x8xf32>
    %cst_26 = arith.constant 9.99999974E-6 : f32
    %62 = vector.broadcast %cst_26 : f32 to vector<4x8x1xf32>
    %63 = arith.addf %59, %62 : vector<4x8x1xf32>
    %64 = math.rsqrt %63 : vector<4x8x1xf32>
    %65 = vector.broadcast %64 : vector<4x8x1xf32> to vector<4x8x8xf32>
    %66 = arith.mulf %61, %65 : vector<4x8x8xf32>
    %c0_27 = arith.constant 0 : index
    %c0_28 = arith.constant 0 : index
    %c0_29 = arith.constant 0 : index
    %67 = vector.load %arg14[%c0_27, %c0_28, %c0_29] : memref<4x1x8xf32, #tpu.memory_space<vmem>>, vector<4x1x8xf32>
    %68 = vector.broadcast %67 : vector<4x1x8xf32> to vector<4x8x8xf32>
    %69 = arith.mulf %66, %68 : vector<4x8x8xf32>
    %c0_30 = arith.constant 0 : index
    %c0_31 = arith.constant 0 : index
    %c0_32 = arith.constant 0 : index
    %70 = vector.load %arg15[%c0_30, %c0_31, %c0_32] : memref<4x1x8xf32, #tpu.memory_space<vmem>>, vector<4x1x8xf32>
    %71 = vector.broadcast %70 : vector<4x1x8xf32> to vector<4x8x8xf32>
    %72 = arith.addf %69, %71 : vector<4x8x8xf32>
    %c0_33 = arith.constant 0 : index
    %c0_34 = arith.constant 0 : index
    %c0_35 = arith.constant 0 : index
    %73 = vector.load %arg7[%c0_33, %c0_34, %c0_35] : memref<4x32x8xbf16, #tpu.memory_space<vmem>>, vector<4x32x8xbf16>
    "tpu.trace_start"() <{level = 10 : i32, message = "hld,hdv->hlv"}> : () -> ()
    %cst_36 = arith.constant dense<0.000000e+00> : vector<4x8x8xf32>
    %74 = tpu.matmul %7, %73, %cst_36 {dimension_numbers = #tpu.dot_dimension_numbers<[2], [1], [1], [2], [0, 0, 0, 1, 1, 2], [0], [0]>} : vector<4x8x32xbf16>, vector<4x32x8xbf16>, vector<4x8x8xf32> -> vector<4x8x8xf32>
    "tpu.trace_stop"() : () -> ()
    %75 = arith.negf %74 : vector<4x8x8xf32>
    %76 = math.exp %75 : vector<4x8x8xf32>
    %cst_37 = arith.constant 1.000000e+00 : f32
    %77 = vector.broadcast %cst_37 : f32 to vector<4x8x8xf32>
    %78 = arith.addf %77, %76 : vector<4x8x8xf32>
    %79 = arith.divf %77, %78 : vector<4x8x8xf32>
    %80 = arith.mulf %74, %79 : vector<4x8x8xf32>
    %81 = arith.mulf %80, %72 : vector<4x8x8xf32>
    %82 = arith.truncf %81 : vector<4x8x8xf32> to vector<4x8x8xbf16>
    %c0_38 = arith.constant 0 : index
    %c0_39 = arith.constant 0 : index
    %c0_40 = arith.constant 0 : index
    %83 = vector.load %arg8[%c0_38, %c0_39, %c0_40] : memref<4x8x32xbf16, #tpu.memory_space<vmem>>, vector<4x8x32xbf16>
    "tpu.trace_start"() <{level = 10 : i32, message = "hlv,hvd->hld"}> : () -> ()
    %cst_41 = arith.constant dense<0.000000e+00> : vector<4x8x32xf32>
    %84 = tpu.matmul %82, %83, %cst_41 {dimension_numbers = #tpu.dot_dimension_numbers<[2], [1], [1], [2], [0, 0, 0, 1, 1, 2], [0], [0]>} : vector<4x8x8xbf16>, vector<4x8x32xbf16>, vector<4x8x32xf32> -> vector<4x8x32xf32>
    "tpu.trace_stop"() : () -> ()
    %cst_42 = arith.constant dense<0.000000e+00> : vector<8x32xf32>
    %85 = vector.multi_reduction <add>, %84, %cst_42 [0] : vector<4x8x32xf32> to vector<8x32xf32>
    %c0_43 = arith.constant 0 : index
    %c0_44 = arith.constant 0 : index
    %c0_45 = arith.constant 0 : index
    %86 = vector.load %arg16[%c0_43, %c0_44, %c0_45] : memref<1x8x32xf32, #tpu.memory_space<vmem>>, vector<1x8x32xf32>
    %87 = vector.shape_cast %86 : vector<1x8x32xf32> to vector<8x32xf32>
    %88 = vector.shape_cast %85 : vector<8x32xf32> to vector<1x8x32xf32>
    tpu.vector_store %arg16[%c0_43, %c0_44, %c0_45], %88 {strides = array<i32>} : memref<1x8x32xf32, #tpu.memory_space<vmem>>, vector<1x8x32xf32>,
    return
  }
  func.func @transform_0(%arg0: i32, %arg1: i32) -> (i32, i32, i32) {
    %c0_i32 = arith.constant 0 : i32
    %c0_i32_0 = arith.constant 0 : i32
    return %arg0, %arg1, %c0_i32 : i32, i32, i32
  }
  func.func @transform_1(%arg0: i32, %arg1: i32) -> (i32, i32, i32) {
    %c0_i32 = arith.constant 0 : i32
    %c0_i32_0 = arith.constant 0 : i32
    %c0_i32_1 = arith.constant 0 : i32
    return %arg0, %c0_i32, %c0_i32_0 : i32, i32, i32
  }
  func.func @transform_2(%arg0: i32, %arg1: i32) -> (i32, i32, i32) {
    %c0_i32 = arith.constant 0 : i32
    %c0_i32_0 = arith.constant 0 : i32
    %c0_i32_1 = arith.constant 0 : i32
    %c0_i32_2 = arith.constant 0 : i32
    return %c0_i32, %c0_i32_0, %c0_i32_1 : i32, i32, i32
  }
  func.func @transform_3(%arg0: i32, %arg1: i32) -> (i32, i32, i32) {
    %c0_i32 = arith.constant 0 : i32
    %c0_i32_0 = arith.constant 0 : i32
    %c0_i32_1 = arith.constant 0 : i32
    %c0_i32_2 = arith.constant 0 : i32
    return %c0_i32, %c0_i32_0, %c0_i32_1 : i32, i32, i32
  }
  func.func @transform_4(%arg0: i32, %arg1: i32) -> (i32, i32, i32) {
    %c0_i32 = arith.constant 0 : i32
    %c0_i32_0 = arith.constant 0 : i32
    %c0_i32_1 = arith.constant 0 : i32
    %c0_i32_2 = arith.constant 0 : i32
    return %c0_i32, %c0_i32_0, %c0_i32_1 : i32, i32, i32
  }
  func.func @transform_5(%arg0: i32, %arg1: i32) -> (i32, i32, i32) {
    %c0_i32 = arith.constant 0 : i32
    %c0_i32_0 = arith.constant 0 : i32
    %c0_i32_1 = arith.constant 0 : i32
    %c0_i32_2 = arith.constant 0 : i32
    return %c0_i32, %c0_i32_0, %c0_i32_1 : i32, i32, i32
  }
  func.func @transform_6(%arg0: i32, %arg1: i32) -> (i32, i32, i32) {
    %c0_i32 = arith.constant 0 : i32
    %c0_i32_0 = arith.constant 0 : i32
    %c0_i32_1 = arith.constant 0 : i32
    %c0_i32_2 = arith.constant 0 : i32
    return %c0_i32, %c0_i32_0, %c0_i32_1 : i32, i32, i32
  }
  func.func @transform_7(%arg0: i32, %arg1: i32) -> (i32, i32) {
    %c0_i32 = arith.constant 0 : i32
    %c0_i32_0 = arith.constant 0 : i32
    return %arg1, %c0_i32 : i32, i32
  }
  func.func @transform_8(%arg0: i32, %arg1: i32) -> (i32, i32) {
    %c0_i32 = arith.constant 0 : i32
    %c0_i32_0 = arith.constant 0 : i32
    return %arg1, %c0_i32 : i32, i32
  }
  func.func @transform_9(%arg0: i32, %arg1: i32) -> (i32, i32) {
    %c0_i32 = arith.constant 0 : i32
    %c0_i32_0 = arith.constant 0 : i32
    %c0_i32_1 = arith.constant 0 : i32
    return %c0_i32, %c0_i32_0 : i32, i32
  }
  func.func @transform_10(%arg0: i32, %arg1: i32) -> (i32, i32) {
    %c0_i32 = arith.constant 0 : i32
    %c0_i32_0 = arith.constant 0 : i32
    %c0_i32_1 = arith.constant 0 : i32
    return %c0_i32, %c0_i32_0 : i32, i32
  }
  func.func @transform_11(%arg0: i32, %arg1: i32) -> (i32, i32, i32) {
    %c0_i32 = arith.constant 0 : i32
    %c0_i32_0 = arith.constant 0 : i32
    %c0_i32_1 = arith.constant 0 : i32
    %c0_i32_2 = arith.constant 0 : i32
    return %c0_i32, %c0_i32_0, %c0_i32_1 : i32, i32, i32
  }
  func.func @transform_12(%arg0: i32, %arg1: i32) -> (i32, i32, i32) {
    %c0_i32 = arith.constant 0 : i32
    %c0_i32_0 = arith.constant 0 : i32
    %c0_i32_1 = arith.constant 0 : i32
    %c0_i32_2 = arith.constant 0 : i32
    return %c0_i32, %c0_i32_0, %c0_i32_1 : i32, i32, i32
  }
  func.func @transform_13(%arg0: i32, %arg1: i32) -> (i32, i32, i32) {
    %c0_i32 = arith.constant 0 : i32
    %c0_i32_0 = arith.constant 0 : i32
    %c0_i32_1 = arith.constant 0 : i32
    %c0_i32_2 = arith.constant 0 : i32
    return %c0_i32, %c0_i32_0, %c0_i32_1 : i32, i32, i32
  }
  func.func @transform_14(%arg0: i32, %arg1: i32) -> (i32, i32, i32) {
    %c0_i32 = arith.constant 0 : i32
    %c0_i32_0 = arith.constant 0 : i32
    return %arg0, %arg1, %c0_i32 : i32, i32, i32
  }
}

</mosaic_0001>

<bundles_post_ra>
// kernel: tpu_custom_call.1
= control target key start
LH: loop header
LB: loop body
LE: loop exit
PB: predicated region body
PF: predicated region fallthrough
CT: control target
= control target key end

     0   :  { %s3702_s0 = inlined_call_operand.vmem [shape: bf16[2,8,32], index: 0, kind: input, shape index: {}]   ;;  %s3703_s1 = inlined_call_operand.vmem [shape: bf16[2,8,32], index: 1, kind: input, shape index: {}]   ;;  %s3704_s2 = inlined_call_operand.vmem [shape: bf16[4,32,8], index: 2, kind: input, shape index: {}]   ;;  %s3705_s3 = inlined_call_operand.vmem [shape: bf16[4,32,8], index: 3, kind: input, shape index: {}]   ;;  %s3706_s4 = inlined_call_operand.vmem [shape: bf16[4,32,8], index: 4, kind: input, shape index: {}]   ;;  %s3707_s5 = inlined_call_operand.vmem [shape: bf16[4,32,8], index: 5, kind: input, shape index: {}]   ;;  %s3708_s6 = inlined_call_operand.vmem [shape: bf16[4,8,32], index: 6, kind: input, shape index: {}]   ;;  %s3709_s7 = inlined_call_operand.vmem [shape: f32[8,8], index: 7, kind: input, shape index: {}]   ;;  %s3710_s8 = inlined_call_operand.vmem [shape: f32[8,8], index: 8, kind: input, shape index: {}]   ;;  %s3711_s9 = inlined_call_operand.vmem [shape: f32[8,8], index: 9, kind: input, shape index: {}]   ;;  %s3712_s10 = inlined_call_operand.vmem [shape: f32[8,8], index: 10, kind: input, shape index: {}]   ;;  %s3713_s11 = inlined_call_operand.vmem [shape: f32[4,1,1], index: 11, kind: input, shape index: {}]   ;;  %s3714_s12 = inlined_call_operand.vmem [shape: f32[4,1,8], index: 12, kind: input, shape index: {}]   ;;  %s3715_s13 = inlined_call_operand.vmem [shape: f32[4,1,8], index: 13, kind: input, shape index: {}]   ;;  %s3716_s14 = inlined_call_operand.hbm [shape: f32[2,8,32], index: 14, kind: output, shape index: {}]  }
   0x1   :  { %3720 = sst [smem:[#allocation10_spill]] %s3702_s0 }
   0x2   :  { %19 = vsyncpa [#allocation5], 0 }
   0x3   :  { %21 = vsyncpa [#allocation5 + $0x1], 0  ;;  %s3149_s29 = smov 0   ;;  %s3151_s30 = smov 0  }
   0x4   :  { %s3153_s15 = smov 0   ;;  %s3155_s16 = smov 0  }
   0x5   :  { %s3157_s17 = smov 0   ;;  %s3159_s18 = smov 0  }
   0x6 LB: > { %3721 = sst [smem:[#allocation7_spill]] %s3062_s17  ;;  %s2499_s19 = sadd.s32 4294967295, %s3066_s18   ;;  %s3066_s18 = sphi %s3159_s18, %s27_s18   ;;  %s3062_s17 = sphi %s3157_s17, %s3730_s17   ;;  %s3058_s16 = sphi %s3155_s16, %s3729_s16   ;;  %s3054_s15 = sphi %s3153_s15, %s3733_s15   ;;  %s3050_s30 = sphi %s3151_s30, %s3732_s30   ;;  %s3046_s29 = sphi %s3149_s29, %s3731_s29  }
   0x7   : > { %s2500_s20 = sadd.s32 4294967294, %s3066_s18   ;;  %s39_s21 = sadd.s32 1, %s3062_s17 }
   0x8   : > { %s364_s22 = sadd.s32 1, %s3054_s15  ;;  %p41_p0 = scmp.ge.s32.totalorder %s39_s21, 2 }
   0x9   : > { %p374_p1 = scmp.ne.s32.totalorder %s3054_s15, %s3050_s30  ;;  %p375_p2 = scmp.eq.s32.totalorder %s2499_s19, 1 }
   0xa   : > { %p380_p3 = scmp.ne.s32.totalorder %s3050_s30, %s3046_s29  ;;  %s3735_s21 = smov (%p41_p0, %s39_s21), 0 }
   0xb   : > { %3722 = sst [smem:[#allocation8_spill]] %s3735_s21  ;;  %p3189_p4 = por %p375_p2, %p374_p1 }
   0xc   : > { %p381_p5 = scmp.eq.s32.totalorder %s2500_s20, 1  ;;  %s359_s24 = ssub.s32 %s3062_s17, %s3735_s21 }
   0xd   : > { %p2505_p6 = scmp.ge.s32.totalorder %s3066_s18, 1  ;;  %p362_p7 = scmp.eq.s32.totalorder %s359_s24, 0 }
   0xe   : > { %p3196_p8 = por %p381_p5, %p380_p3  ;;  %p460_p9 = scmp.lt.s32.totalorder %s3066_s18, 3 }
   0xf   : > { %s3202_s26 = scalar_select %p362_p7, %s3054_s15, %s364_s22  }
  0x10   : > { %p461_p10 = pnand %p2505_p6, %p460_p9 }
  0x11   : > { %3725 = sst [smem:[#allocation9_spill]] %s3202_s26  ;;  %v2924_v0 = vld [vmem:[%s3705_s3] sm:$0xff] (!%p461_p10)   ;;  %v3068_v1 = vmov (!%p461_p10), 0.0   ;;  %v2925_v2 = vld [vmem:[%s3705_s3 + $0x10] sm:$0xff] (!%p461_p10)   ;;  %v2926_v3 = vld [vmem:[%s3705_s3 + $0x8] sm:$0xff] (!%p461_p10)   ;;  %vm3069_vm0 = vmmov (!%p461_p10), 0  }
  0x12   : > { %464 = sbr.rel (%p461_p10) target bundleno = 1382 (0x566), region = 76  ;;  %2662 = vmatprep.subr.bf16.mxu0 (!%p461_p10), %v3068_v1  ;;  %2670 = vmatprep.subr.bf16.mxu1 (!%p461_p10), %v3068_v1  ;;  %p520_p11 = scmp.lt.s32.totalorder (!%p461_p10), %s3058_s16, 1  ;;  %v2927_v4 = vld [vmem:[%s3705_s3 + $0x18] sm:$0xff] (!%p461_p10)   ;;  %vm573_vm1 = vcmask (!%p461_p10), 261120   ;;  %v2928_v5 = vld [vmem:[%s3705_s3 + $0x20] sm:$0xff] (!%p461_p10)   ;;  %v2929_v6 = vld [vmem:[%s3705_s3 + $0x30] sm:$0xff] (!%p461_p10)  }
  0x13   : > { %2663 = vmatpush3.bf16.msra.mxu0 (!%p461_p10), %v2924_v0  ;;  %2666 = vmatprep.mubr.msk.bf16.mxu0 (!%p461_p10), %vm3069_vm0, %v3068_v1  ;;  %v2930_v8 = vld [vmem:[%s3705_s3 + $0x28] sm:$0xff] (!%p461_p10)   ;;  %v2931_v9 = vld [vmem:[%s3705_s3 + $0x38] sm:$0xff] (!%p461_p10)   ;;  %v2932_v10 = vld [vmem:[%s3706_s4] sm:$0xff] (!%p461_p10)   ;;  %s3727_s0 = sld [smem:[#allocation10_spill]] (!%p461_p10)  ;;  %s3071_s24 = smov (!%p461_p10), 4   ;;  %vm1048_vm2 = vcmask (!%p461_p10), 60416  }
  0x14   : > { %2671 = vmatpush3.bf16.msra.mxu1 (!%p461_p10), %v2925_v2  ;;  %2664 = vmatprep.subr.bf16.mxu0 (!%p461_p10), %v3068_v1  ;;  %v2933_v11 = vld [vmem:[%s3706_s4 + $0x10] sm:$0xff] (!%p461_p10)   ;;  %v2934_v12 = vld [vmem:[%s3706_s4 + $0x8] sm:$0xff] (!%p461_p10)   ;;  %v2935_v13 = vld [vmem:[%s3706_s4 + $0x18] sm:$0xff] (!%p461_p10)   ;;  %vm1030_vm3 = vcmask (!%p461_p10), 31744   ;;  %vm1345_vm4 = vcmask (!%p461_p10), 64512   ;;  %vm1616_vm5 = vcmask (!%p461_p10), 1043456  }
  0x15   : > { %2672 = vmatprep.subr.bf16.mxu1 (!%p461_p10), %v3068_v1  ;;  %2674 = vmatprep.mubr.msk.bf16.mxu1 (!%p461_p10), %vm3069_vm0, %v3068_v1  ;;  %v2936_v14 = vld [vmem:[%s3706_s4 + $0x20] sm:$0xff] (!%p461_p10)   ;;  %v2937_v15 = vld [vmem:[%s3706_s4 + $0x30] sm:$0xff] (!%p461_p10)   ;;  %v2938_v16 = vld [vmem:[%s3706_s4 + $0x28] sm:$0xff] (!%p461_p10)   ;;  %s517_s26 = sand.u32 (!%p461_p10), 1, %s3050_s30  }
  0x16   : > { %v2939_v17 = vld [vmem:[%s3706_s4 + $0x38] sm:$0xff] (!%p461_p10)   ;;  %v2940_v18 = vld [vmem:[%s3704_s2] sm:$0xff] (!%p461_p10)   ;;  %v2941_v19 = vld [vmem:[%s3704_s2 + $0x10] sm:$0xff] (!%p461_p10)  }
  0x17   : > { %2665 = vmatpush3.bf16.msra.mxu0 (!%p461_p10), %v2926_v3  ;;  %v2942_v20 = vld [vmem:[%s3704_s2 + $0x8] sm:$0xff] (!%p461_p10)   ;;  %v2943_v21 = vld [vmem:[%s3704_s2 + $0x18] sm:$0xff] (!%p461_p10)   ;;  %v2944_v23 = vld [vmem:[%s3704_s2 + $0x20] sm:$0xff] (!%p461_p10)  }
  0x18   : > { %2673 = vmatpush3.bf16.msra.mxu1 (!%p461_p10), %v2927_v4  ;;  %2678 = vmatprep.subr.bf16.mxu0 (!%p461_p10), %v3068_v1  ;;  %v2945_v24 = vld [vmem:[%s3704_s2 + $0x30] sm:$0xff] (!%p461_p10)   ;;  %v2946_v25 = vld [vmem:[%s3704_s2 + $0x28] sm:$0xff] (!%p461_p10)   ;;  %v2947_v26 = vld [vmem:[%s3704_s2 + $0x38] sm:$0xff] (!%p461_p10)  }
  0x19   : > { %s3226_s19 = scalar_select %p520_p11, %s3058_s16, 1  ;;  %2686 = vmatprep.subr.bf16.mxu1 %v3068_v1 }
  0x1b   : > { %s3719_s20 = sshll.u32 %s3226_s19, 2 }
  0x1c   : > { %s530_s21 = scalar_lea.vmem %s3703_s1, %s3719_s20  ;;  %s2506_s20 = sshll.u32 %s517_s26, 3 }
  0x1d   : > { %v544_v7 = vld [vmem:[%s530_s21] sm:$0xf]  ;;  %s3726_s21 = sshll.u32 %s3226_s19, 2 }
  0x1e   : > { %2667 = vmatmul.mubr.msk.bf16.vlgmr.msra.gmra.mrb[0].mxu0 %vm573_vm1, %v544_v7  ;;  %2675 = vmatmul.mubr.msk.bf16.vlgmr.msra.gmra.mrb[0].mxu1 %vm573_vm1, %v544_v7  ;;  %s526_s22 = scalar_lea.vmem %s3727_s0, %s3726_s21  ;;  %s3073_s21 = smov [#allocation4]  }
  0x1f   : > { %2679 = vmatpush3.bf16.msra.mxu0 %v2928_v5  ;;  %2687 = vmatpush3.bf16.msra.mxu1 %v2929_v6  ;;  %v3327_v22 = vld [vmem:[%s526_s22] sm:$0xf]  ;;  %s3070_s22 = smov 124  }
  0x20   : > { %2680 = vmatprep.subr.bf16.mxu0 %v3068_v1  ;;  %2688 = vmatprep.subr.bf16.mxu1 %v3068_v1 }
  0x21   : > { %2682 = vmatprep.mubr.msk.bf16.mxu0 %vm3069_vm0, %v3068_v1  ;;  %2690 = vmatprep.mubr.msk.bf16.mxu1 %vm3069_vm0, %v3068_v1 }
  0x23   : > { %2681 = vmatpush3.bf16.msra.mxu0 %v2930_v8  ;;  %2689 = vmatpush3.bf16.msra.mxu1 %v2931_v9 }
  0x24   : > { %2694 = vmatprep.subr.bf16.mxu0 %v3068_v1  ;;  %2702 = vmatprep.subr.bf16.mxu1 %v3068_v1 }
  0x26   : > { %2683 = vmatmul.mubr.msk.bf16.vlgmr.msra.gmra.mrb[4].mxu0 %vm573_vm1, %v544_v7  ;;  %2691 = vmatmul.mubr.msk.bf16.vlgmr.msra.gmra.mrb[4].mxu1 %vm573_vm1, %v544_v7 }
  0x27   : > { %2695 = vmatpush3.bf16.msra.mxu0 %v2932_v10  ;;  %2703 = vmatpush3.bf16.msra.mxu1 %v2933_v11 }
  0x28   : > { %2696 = vmatprep.subr.bf16.mxu0 %v3068_v1  ;;  %2704 = vmatprep.subr.bf16.mxu1 %v3068_v1 }
  0x29   : > { %2698 = vmatprep.mubr.msk.bf16.mxu0 %vm3069_vm0, %v3068_v1  ;;  %2706 = vmatprep.mubr.msk.bf16.mxu1 %vm3069_vm0, %v3068_v1 }
  0x2b   : > { %2697 = vmatpush3.bf16.msra.mxu0 %v2934_v12  ;;  %2705 = vmatpush3.bf16.msra.mxu1 %v2935_v13  ;;  %v3072_v13 = vmov 0  }
  0x2c   : > { %2710 = vmatprep.subr.bf16.mxu0 %v3068_v1  ;;  %2718 = vmatprep.subr.bf16.mxu1 %v3068_v1 }
  0x2d   : > { %2922 = vset.pattern.permute.xlu0 %v3072_v13  ;;  %2923 = vset.pattern.permute.xlu1 %v3072_v13 }
  0x2e   : > { %2699 = vmatmul.mubr.msk.bf16.vlgmr.msra.gmra.mrb[8].mxu0 %vm573_vm1, %v544_v7  ;;  %2707 = vmatmul.mubr.msk.bf16.vlgmr.msra.gmra.mrb[8].mxu1 %vm573_vm1, %v544_v7 }
  0x2f   : > { %2711 = vmatpush3.bf16.msra.mxu0 %v2936_v14  ;;  %2719 = vmatpush3.bf16.msra.mxu1 %v2937_v15 }
  0x30   : > { %2712 = vmatprep.subr.bf16.mxu0 %v3068_v1  ;;  %2720 = vmatprep.subr.bf16.mxu1 %v3068_v1 }
  0x31   : > { %2714 = vmatprep.mubr.msk.bf16.mxu0 %vm3069_vm0, %v3068_v1  ;;  %2722 = vmatprep.mubr.msk.bf16.mxu1 %vm3069_vm0, %v3068_v1 }
  0x33   : > { %2713 = vmatpush3.bf16.msra.mxu0 %v2938_v16  ;;  %2721 = vmatpush3.bf16.msra.mxu1 %v2939_v17  ;;  %v2550_v17 = vld [vmem:[%s3713_s11] ss:$0 sm:$0xff] }
  0x34   : > { %2726 = vmatprep.subr.bf16.mxu0 %v3068_v1  ;;  %2734 = vmatprep.subr.bf16.mxu1 %v3068_v1 }
  0x36   : > { %2715 = vmatmul.mubr.msk.bf16.vlgmr.msra.gmra.mrb[12].mxu0 %vm573_vm1, %v544_v7  ;;  %2723 = vmatmul.mubr.msk.bf16.vlgmr.msra.gmra.mrb[12].mxu1 %vm573_vm1, %v544_v7 }
  0x37   : > { %2727 = vmatpush3.bf16.msra.mxu0 %v2940_v18  ;;  %2735 = vmatpush3.bf16.msra.mxu1 %v2941_v19  ;;  %v2551_v18 = vld [vmem:[%s3713_s11 + $0x1] ss:$0 sm:$0xff]  ;;  %v2553_v19 = vld [vmem:[%s3713_s11 + $0x3] ss:$0 sm:$0xff] }
  0x38   : > { %2728 = vmatprep.subr.bf16.mxu0 %v3068_v1  ;;  %2736 = vmatprep.subr.bf16.mxu1 %v3068_v1 }
  0x39   : > { %2730 = vmatprep.mubr.msk.bf16.mxu0 %vm3069_vm0, %v3068_v1  ;;  %2738 = vmatprep.mubr.msk.bf16.mxu1 %vm3069_vm0, %v3068_v1 }
  0x3b   : > { %2729 = vmatpush3.bf16.msra.mxu0 %v2942_v20  ;;  %2737 = vmatpush3.bf16.msra.mxu1 %v2943_v21  ;;  %v2552_v20 = vld [vmem:[%s3713_s11 + $0x2] ss:$0 sm:$0xff] }
  0x3c   : > { %2742 = vmatprep.subr.bf16.mxu0 %v3068_v1  ;;  %2750 = vmatprep.subr.bf16.mxu1 %v3068_v1 }
  0x3e   : > { %2731 = vmatmul.mubr.msk.bf16.vlgmr.msra.gmra.mrb[16].mxu0 %vm573_vm1, %v3327_v22  ;;  %2739 = vmatmul.mubr.msk.bf16.vlgmr.msra.gmra.mrb[16].mxu1 %vm573_vm1, %v3327_v22 }
  0x3f   : > { %2743 = vmatpush3.bf16.msra.mxu0 %v2944_v23  ;;  %2751 = vmatpush3.bf16.msra.mxu1 %v2945_v24  ;;  %v997_v24 = vld [vmem:[%s3711_s9] sm:$0xff] }
  0x40   : > { %2744 = vmatprep.subr.bf16.mxu0 %v3068_v1  ;;  %2752 = vmatprep.subr.bf16.mxu1 %v3068_v1 }
  0x41   : > { %2746 = vmatprep.mubr.msk.bf16.mxu0 %vm3069_vm0, %v3068_v1  ;;  %2754 = vmatprep.mubr.msk.bf16.mxu1 %vm3069_vm0, %v3068_v1 }
  0x43   : > { %2745 = vmatpush3.bf16.msra.mxu0 %v2946_v25  ;;  %2753 = vmatpush3.bf16.msra.mxu1 %v2947_v26  ;;  %v1035_v25 = vld [vmem:[%s3712_s10] sm:$0xff] }
  0x44   : > { %2758 = vmatprep.subr.bf16.mxu0 %v3068_v1  ;;  %2764 = vmatprep.subr.bf16.mxu1 %v3068_v1 }
  0x46   : > { %2747 = vmatmul.mubr.msk.bf16.vlgmr.msra.gmra.mrb[20].mxu0 %vm573_vm1, %v3327_v22  ;;  %2755 = vmatmul.mubr.msk.bf16.vlgmr.msra.gmra.mrb[20].mxu1 %vm573_vm1, %v3327_v22 }
  0x47   : > { %2760 = vmatprep.mubr.msk.bf16.mxu0 %vm3069_vm0, %v3068_v1  ;;  %2766 = vmatprep.mubr.msk.bf16.mxu1 %vm3069_vm0, %v3068_v1 }
  0xf1   : > { %v3363_v27 = vpop.f32.mrb[0].mxu0  ;;  %v3365_v28 = vpop.f32.mrb[0].mxu1 }
  0xf2   : > { %1006 = vrot.lane.b32.xlu0 %v3363_v27, %s3070_s22  ;;  %v2668_v29 = vpop.f32.mrb[1].mxu0  ;;  %1008 = vrot.lane.b32.xlu1 %v3365_v28, %s3070_s22  ;;  %v2676_v31 = vpop.f32.mrb[1].mxu1 }
  0xf3   : > { %v614_v30 = vpop.f32.mrb[2].mxu0  ;;  %v666_v33 = vpop.f32.mrb[2].mxu1  ;;  %v998_v31 = vmul.f32 %v997_v24, %v3363_v27 }
  0xf4   : > { %v2669_v32 = vpop.f32.mrb[3].mxu0  ;;  %v2677_v34 = vpop.f32.mrb[3].mxu1 }
  0xf5   : > { %v999_v34 = vmul.f32 %v997_v24, %v3365_v28 }
  0xf6   : > { %1018 = vrot.lane.b32.xlu0 %v3363_v27, %s3071_s24  ;;  %1020 = vrot.lane.b32.xlu1 %v3365_v28, %s3071_s24 }
  0xf9   : > { %v3375_v35 = vpop.f32.mrb[4].mxu0  ;;  %v3379_v37 = vpop.f32.mrb[4].mxu1 }
  0xfa   : > { %1010 = vrot.lane.b32.xlu0 %v3375_v35, %s3070_s22  ;;  %v2684_v36 = vpop.f32.mrb[5].mxu0  ;;  %1022 = vrot.lane.b32.xlu1 %v3375_v35, %s3071_s24  ;;  %v2692_v39 = vpop.f32.mrb[5].mxu1 }
  0xfb   : > { %v718_v38 = vpop.f32.mrb[6].mxu0  ;;  %v770_v41 = vpop.f32.mrb[6].mxu1 }
  0xfc   : > { %v2685_v40 = vpop.f32.mrb[7].mxu0  ;;  %v2693_v42 = vpop.f32.mrb[7].mxu1 }
  0xfe   : > { %1012 = vrot.lane.b32.xlu0 %v3379_v37, %s3070_s22  ;;  %1024 = vrot.lane.b32.xlu1 %v3379_v37, %s3071_s24 }
 0x101   : > { %v835_v43 = vpop.f32.mrb[8].mxu0  ;;  %v887_v46 = vpop.f32.mrb[8].mxu1 }
 0x102   : > { %v1053_v44 = vpack.c.bf16 %v835_v43, %v835_v43  ;;  %v2700_v45 = vpop.f32.mrb[9].mxu0  ;;  %v1054_v48 = vpack.c.bf16 %v887_v46, %v887_v46  ;;  %v2708_v49 = vpop.f32.mrb[9].mxu1 }
 0x103   : > { %v838_v47 = vpop.f32.mrb[10].mxu0  ;;  %v890_v51 = vpop.f32.mrb[10].mxu1  ;;  %v1001_v49 = vmul.f32 %v997_v24, %v3379_v37  ;;  %v1290_v37 = vld [vmem:[%s3709_s7] sm:$0xff] }
 0x104   : > { %1057 = vst.msk [vmem:[#allocation3] sm:$0xf] %vm1048_vm2, %v1053_v44  ;;  %v2701_v50 = vpop.f32.mrb[11].mxu0  ;;  %1058 = vst.msk [vmem:[#allocation3 + $0x4] sm:$0xf] %vm1048_vm2, %v1054_v48  ;;  %v2709_v52 = vpop.f32.mrb[11].mxu1  ;;  %v1000_v44 = vmul.f32 %v997_v24, %v3375_v35 }
 0x109   : > { %v939_v53 = vpop.f32.mrb[12].mxu0  ;;  %v991_v56 = vpop.f32.mrb[12].mxu1 }
 0x10a   : > { %v1055_v54 = vpack.c.bf16 %v939_v53, %v939_v53  ;;  %v2716_v55 = vpop.f32.mrb[13].mxu0  ;;  %v1056_v58 = vpack.c.bf16 %v991_v56, %v991_v56  ;;  %v2724_v59 = vpop.f32.mrb[13].mxu1 }
 0x10b   : > { %v942_v57 = vpop.f32.mrb[14].mxu0  ;;  %v994_v61 = vpop.f32.mrb[14].mxu1 }
 0x10c   : > { %1059 = vst.msk [vmem:[#allocation3 + $0x8] sm:$0xf] %vm1048_vm2, %v1055_v54  ;;  %v2717_v60 = vpop.f32.mrb[15].mxu0  ;;  %1060 = vst.msk [vmem:[#allocation3 + $0xc] sm:$0xf] %vm1048_vm2, %v1056_v58  ;;  %v2725_v62 = vpop.f32.mrb[15].mxu1 }
 0x10d   : > { %v1328_v57 = vld [vmem:[%s3710_s8] sm:$0xff] }
 0x111   : > { %v3391_v63 = vpop.f32.mrb[16].mxu0  ;;  %v3397_v2 = vpop.f32.mrb[16].mxu1 }
 0x112   : > { %1311 = vrot.lane.b32.xlu1 %v3391_v63, %s3071_s24  ;;  %1299 = vrot.lane.b32.xlu0 %v3391_v63, %s3070_s22  ;;  %v2732_v0 = vpop.f32.mrb[17].mxu0  ;;  %v2740_v4 = vpop.f32.mrb[17].mxu1  ;;  %v1291_v61 = vmul.f32 %v1290_v37, %v3391_v63 }
 0x113   : > { %v1131_v3 = vpop.f32.mrb[18].mxu0  ;;  %v1183_v6 = vpop.f32.mrb[18].mxu1 }
 0x114   : > { %v2733_v5 = vpop.f32.mrb[19].mxu0  ;;  %v2741_v7 = vpop.f32.mrb[19].mxu1 }
 0x115   : > { %v1292_v7 = vmul.f32 %v1290_v37, %v3397_v2 }
 0x116   : > { %1313 = vrot.lane.b32.xlu1 %v3397_v2, %s3071_s24  ;;  %1301 = vrot.lane.b32.xlu0 %v3397_v2, %s3070_s22 }
 0x119   : > { %v3403_v8 = vpop.f32.mrb[20].mxu0  ;;  %v3409_v10 = vpop.f32.mrb[20].mxu1 }
 0x11a   : > { %1315 = vrot.lane.b32.xlu1 %v3403_v8, %s3071_s24  ;;  %1303 = vrot.lane.b32.xlu0 %v3403_v8, %s3070_s22  ;;  %v2748_v9 = vpop.f32.mrb[21].mxu0  ;;  %v2756_v12 = vpop.f32.mrb[21].mxu1 }
 0x11b   : > { %v1235_v11 = vpop.f32.mrb[22].mxu0  ;;  %v1287_v15 = vpop.f32.mrb[22].mxu1 }
 0x11c   : > { %v2749_v14 = vpop.f32.mrb[23].mxu0  ;;  %v2757_v16 = vpop.f32.mrb[23].mxu1 }
 0x11e   : > { %1317 = vrot.lane.b32.xlu1 %v3409_v10, %s3071_s24  ;;  %1305 = vrot.lane.b32.xlu0 %v3409_v10, %s3070_s22  ;;  %s2587_s22 = sshll.u32 %s3058_s16, 7  ;;  %s519_s24 = scalar_lea.vmem [#allocation4], %s2506_s20 }
 0x11f   : > { %s2386_s27 = sshll.u32 %s519_s24, 4  ;;  %s3654_s28 = scalar_lea.hbm %s3716_s14, %s2587_s22  ;;  %s3656_s27 = int_to_ptr.vmem [resolvable:$true] %s2386_s27 }
 0x120   : > { %s2372_s16 = scalar_lea.sflag [#allocation5], %s517_s26  ;;  %s2988_s17 = scalar_lea.vmem %s3656_s27, 128 }
 0x121   : > { %p2989_p12 = scmp.ne.s32.totalorder %s3656_s27, %s2988_s17  ;;  %s2992_s20 = sshll.u32 %s3073_s21, 4  ;;  %s2993_s20 = int_to_ptr.vmem [resolvable:$false] %s2992_s20 }
 0x122   : > { %1567 = vperm.xlu0 %2922, %v2550_v17   ;;  %1571 = vperm.xlu1 %2923, %v2551_v18   ;;  %v1293_v17 = vmul.f32 %v1290_v37, %v3403_v8  ;;  %v1294_v8 = vmul.f32 %v1290_v37, %v3409_v10  ;;  %s2994_s19 = scalar_lea.vmem %s2993_s20, 256  ;;  %p2995_p1 = scmp.lt.s32.totalorder %s3656_s27, %s2993_s20 }
 0x123   : > { %p2990_p13 = pnand %p2989_p12, %p3189_p4  ;;  %p2996_p2 = scmp.lt.s32.totalorder %s2994_s19, %s2988_s17 }
 0x125   : > { %p2991_p0 = pneg %p2990_p13  ;;  %p2997_p3 = por %p2996_p2, %p2995_p1 }
 0x126   : > { %1579 = vperm.xlu0 %2922, %v2553_v19   ;;  %1575 = vperm.xlu1 %2923, %v2552_v20  }
 0x127   : > { %p2998_p5 = pnand %p2997_p3, %p2991_p0 }
 0x164   : > { %v1007_v21 = vpop.permute.xlu0 %1006  ;;  %v1009_v23 = vpop.permute.xlu1 %1008 }
 0x168   : > { %v1019_v26 = vpop.permute.xlu0 %1018  ;;  %v1021_v29 = vpop.permute.xlu1 %1020 }
 0x169   : > { %v1031_v30 = vsel %vm1030_vm3, %v1007_v21, %v1019_v26  ;;  %v1032_v32 = vsel %vm1030_vm3, %v1009_v23, %v1021_v29 }
 0x16a   : > { %v1036_v33 = vmul.f32 %v1035_v25, %v1031_v30  ;;  %v1037_v36 = vmul.f32 %v1035_v25, %v1032_v32  ;;  %v1610_v32 = vld [vmem:[#allocation3 + $0x4] sm:$0xf] }
 0x16b   : > { %v1664_v10 = vsel %vm1616_vm5, %v1610_v32, 0  ;;  %v2952_v32 = vld [vmem:[%s3707_s5 + $0x20] sm:$0xff]  }
 0x16c   : > { %v1040_v38 = vadd.f32 %v1036_v33, %v998_v31  ;;  %v1011_v39 = vpop.permute.xlu0 %1010  ;;  %v1041_v40 = vadd.f32 %v1037_v36, %v999_v34  ;;  %v1023_v41 = vpop.permute.xlu1 %1022  ;;  %v1531_v34 = vlaneseq }
 0x16d   : > { %v1033_v43 = vsel %vm1030_vm3, %v1011_v39, %v1023_v41 }
 0x16e   : > { %v1044_v42 = vpack.c.bf16 %v1040_v38, %v1040_v38  ;;  %v1045_v45 = vpack.c.bf16 %v1041_v40, %v1041_v40  ;;  %v1038_v46 = vmul.f32 %v1035_v25, %v1033_v43  ;;  %v1532_v36 = vshrl.u32 %v1531_v34, 7 }
 0x16f   : > { %v1536_v38 = vand.u32 127, %v1531_v34  ;;  %v2955_v34 = vld [vmem:[%s3707_s5 + $0x38] sm:$0xff]  }
 0x170   : > { %1049 = vst.msk [vmem:[#allocation2] sm:$0xf] %vm1048_vm2, %v1044_v42  ;;  %v1013_v27 = vpop.permute.xlu0 %1012  ;;  %1050 = vst.msk [vmem:[#allocation2 + $0x4] sm:$0xf] %vm1048_vm2, %v1045_v45  ;;  %v1042_v47 = vadd.f32 %v1038_v46, %v1000_v44  ;;  %v1025_v48 = vpop.permute.xlu1 %1024 }
 0x171   : > { %v1034_v28 = vsel %vm1030_vm3, %v1013_v27, %v1025_v48  ;;  %v1537_v39 = vsub.s32 %v1532_v36, %v1536_v38  ;;  %vm1594_vm6 = vcmp.gt.s32.totalorder %v1536_v38, %v1532_v36 }
 0x172   : > { %v1046_v50 = vpack.c.bf16 %v1042_v47, %v1042_v47  ;;  %v1039_v51 = vmul.f32 %v1035_v25, %v1034_v28  ;;  %v1609_v25 = vld [vmem:[#allocation3] sm:$0xf] }
 0x173   : > { %v1618_v31 = vsel %vm1616_vm5, %v1609_v25, 0  ;;  %v1539_v40 = vsub.s32 0, %v1537_v39 }
 0x174   : > { %1051 = vst.msk [vmem:[#allocation2 + $0x8] sm:$0xf] %vm1048_vm2, %v1046_v50  ;;  %v1043_v52 = vadd.f32 %v1039_v51, %v1001_v49 }
 0x175   : > { %v2549_v41 = vmin.u32 %v1539_v40, %v1537_v39 }
 0x176   : > { %v1047_v35 = vpack.c.bf16 %v1043_v52, %v1043_v52 }
 0x177   : > { %v1341_v53 = vld [vmem:[#allocation2] sm:$0xf]  ;;  %v1342_v55 = vld [vmem:[#allocation2 + $0x4] sm:$0xf]  ;;  %v1541_v42 = vcvt.s32.f32 %v2549_v41 }
 0x178   : > { %v1350_v54 = vsel %vm1345_vm4, %v1341_v53, 0  ;;  %1052 = vst.msk [vmem:[#allocation2 + $0xc] sm:$0xf] %vm1048_vm2, %v1047_v35  ;;  %v1396_v56 = vsel %vm1345_vm4, %v1342_v55, 0 }
 0x179   : > { %2759 = vmatpush3.bf16.xpose.msra.mxu0 %v1350_v54  ;;  %2765 = vmatpush3.bf16.xpose.msra.mxu1 %v1396_v56 }
 0x17a   : > { %2770 = vmatprep.subr.bf16.mxu0 %v3068_v1  ;;  %2776 = vmatprep.subr.bf16.mxu1 %v3068_v1 }
 0x17b   : > { %v1343_v6 = vld [vmem:[#allocation2 + $0x8] sm:$0xf] }
 0x17c   : > { %v1442_v13 = vsel %vm1345_vm4, %v1343_v6, 0 }
 0x17f   : > { %v1344_v16 = vld [vmem:[#allocation2 + $0xc] sm:$0xf] }
 0x180   : > { %v1488_v20 = vsel %vm1345_vm4, %v1344_v16, 0 }
 0x184   : > { %v1312_v58 = vpop.permute.xlu1 %1311  ;;  %v1300_v59 = vpop.permute.xlu0 %1299 }
 0x185   : > { %v1324_v60 = vsel %vm1030_vm3, %v1300_v59, %v1312_v58  ;;  %v1611_v59 = vld [vmem:[#allocation3 + $0x8] sm:$0xf] }
 0x186   : > { %v1329_v62 = vmul.f32 %v1328_v57, %v1324_v60 }
 0x188   : > { %v1333_v0 = vadd.f32 %v1329_v62, %v1291_v61  ;;  %v1314_v3 = vpop.permute.xlu1 %1313  ;;  %v1302_v4 = vpop.permute.xlu0 %1301 }
 0x189   : > { %v1325_v5 = vsel %vm1030_vm3, %v1302_v4, %v1314_v3 }
 0x18a   : > { %v1337_v9 = vpack.c.bf16 %v1333_v0, %v1333_v0  ;;  %v1330_v11 = vmul.f32 %v1328_v57, %v1325_v5  ;;  %v1710_v5 = vsel %vm1616_vm5, %v1611_v59, 0 }
 0x18c   : > { %v1334_v12 = vadd.f32 %v1330_v11, %v1292_v7  ;;  %2761 = vmatmul.mubr.msk.bf16.vlgmr.msra.gmra.mrb[24].mxu0 %vm1345_vm4, %v1337_v9  ;;  %v1316_v14 = vpop.permute.xlu1 %1315  ;;  %v1304_v15 = vpop.permute.xlu0 %1303  ;;  %v1612_v7 = vld [vmem:[#allocation3 + $0xc] sm:$0xf] }
 0x18d   : > { %2771 = vmatpush3.bf16.xpose.msra.mxu0 %v1442_v13  ;;  %v1326_v63 = vsel %vm1030_vm3, %v1304_v15, %v1316_v14  ;;  %2772 = vmatprep.mubr.msk.bf16.mxu0 %vm3069_vm0, %v3068_v1  ;;  %v1756_v16 = vsel %vm1616_vm5, %v1612_v7, 0 }
 0x18e   : > { %v1338_v18 = vpack.c.bf16 %v1334_v12, %v1334_v12  ;;  %v1331_v2 = vmul.f32 %v1328_v57, %v1326_v63  ;;  %2782 = vmatprep.subr.bf16.mxu0 %v3068_v1 }
 0x190   : > { %v1335_v19 = vadd.f32 %v1331_v2, %v1293_v17  ;;  %2767 = vmatmul.mubr.msk.bf16.vlgmr.msra.gmra.mrb[24].mxu1 %vm1345_vm4, %v1338_v18  ;;  %v1318_v21 = vpop.permute.xlu1 %1317  ;;  %v1306_v23 = vpop.permute.xlu0 %1305 }
 0x191   : > { %2777 = vmatpush3.bf16.xpose.msra.mxu1 %v1488_v20  ;;  %v1327_v24 = vsel %vm1030_vm3, %v1306_v23, %v1318_v21  ;;  %2778 = vmatprep.mubr.msk.bf16.mxu1 %vm3069_vm0, %v3068_v1 }
 0x192   : > { %v1339_v26 = vpack.c.bf16 %v1335_v19, %v1335_v19  ;;  %v1332_v29 = vmul.f32 %v1328_v57, %v1327_v24  ;;  %2788 = vmatprep.subr.bf16.mxu1 %v3068_v1 }
 0x194   : > { %v1336_v30 = vadd.f32 %v1332_v29, %v1294_v8  ;;  %2773 = vmatmul.mubr.msk.bf16.vlgmr.msra.gmra.mrb[28].mxu0 %vm1345_vm4, %v1339_v26  ;;  %v2948_v26 = vld [vmem:[%s3707_s5] sm:$0xff]   ;;  %v2949_v29 = vld [vmem:[%s3707_s5 + $0x10] sm:$0xff]  }
 0x195   : > { %2783 = vmatpush3.bf16.msra.mxu0 %v1618_v31  ;;  %2784 = vmatprep.mubr.msk.bf16.mxu0 %vm3069_vm0, %v3068_v1  ;;  %v2951_v31 = vld [vmem:[%s3707_s5 + $0x18] sm:$0xff]  }
 0x196   : > { %v1340_v33 = vpack.c.bf16 %v1336_v30, %v1336_v30  ;;  %2794 = vmatprep.subr.bf16.mxu0 %v3068_v1  ;;  %v2950_v30 = vld [vmem:[%s3707_s5 + $0x8] sm:$0xff]  }
 0x198   : > { %2779 = vmatmul.mubr.msk.bf16.vlgmr.msra.gmra.mrb[28].mxu1 %vm1345_vm4, %v1340_v33  ;;  %v2953_v33 = vld [vmem:[%s3707_s5 + $0x30] sm:$0xff]  }
 0x199   : > { %2789 = vmatpush3.bf16.msra.mxu1 %v1664_v10  ;;  %2790 = vmatprep.mubr.msk.bf16.mxu1 %vm3069_vm0, %v3068_v1  ;;  %v2954_v10 = vld [vmem:[%s3707_s5 + $0x28] sm:$0xff]  }
 0x19a   : > { %2800 = vmatprep.subr.bf16.mxu1 %v3068_v1 }
 0x1a1   : > { %v1568_v43 = vpop.permute.xlu0 %1567  ;;  %v1572_v45 = vpop.permute.xlu1 %1571 }
 0x1a2   : > { %v1582_v44 = vmul.f32 %v1568_v43, %v1541_v42  ;;  %v1583_v27 = vmul.f32 %v1572_v45, %v1541_v42 }
 0x1a4   : > { %v1586_v46 = vmul.f32 1.442695, %v1582_v44  ;;  %v1588_v48 = vmul.f32 1.442695, %v1583_v27 }
 0x1a5   : > { %v1576_v47 = vpop.permute.xlu1 %1575  ;;  %v1580_v49 = vpop.permute.xlu0 %1579 }
 0x1a6   : > { %2956 = vpow2.f32 %v1586_v46  ;;  %v1584_v28 = vmul.f32 %v1576_v47, %v1541_v42  ;;  %v1585_v50 = vmul.f32 %v1580_v49, %v1541_v42 }
 0x1a7   : > { %2958 = vpow2.f32 %v1588_v48 }
 0x1a8   : > { %v1590_v51 = vmul.f32 1.442695, %v1584_v28  ;;  %v1592_v35 = vmul.f32 1.442695, %v1585_v50 }
 0x1aa   : > { %2960 = vpow2.f32 %v1590_v51 }
 0x1ab   : > { %2962 = vpow2.f32 %v1592_v35 }
 0x1b0   : > { %v2957_v52 = vpop.eup %2956 }
 0x1b1   : > { %v1597_v53 = vsel %vm1594_vm6, 0.0, %v2957_v52  ;;  %v2959_v54 = vpop.eup %2958 }
 0x1b2   : > { %v1598_v58 = vsel %vm1594_vm6, 0.0, %v2959_v54 }
 0x1b4   : > { %v2961_v0 = vpop.eup %2960 }
 0x1b5   : > { %v1599_v13 = vsel %vm1594_vm6, 0.0, %v2961_v0  ;;  %v2963_v14 = vpop.eup %2962 }
 0x1b6   : > { %v1600_v20 = vsel %vm1594_vm6, 0.0, %v2963_v14 }
 0x25f   : > { %v1386_v55 = vpop.f32.mrb[24].mxu0 }
 0x260   : > { %v1601_v56 = vmul.f32 %v1597_v53, %v1386_v55  ;;  %v2762_v37 = vpop.f32.mrb[25].mxu0 }
 0x261   : > { %v1389_v57 = vpop.f32.mrb[26].mxu0 }
 0x262   : > { %v1605_v60 = vpack.c.bf16 %v1601_v56, %v1601_v56  ;;  %v2763_v61 = vpop.f32.mrb[27].mxu0 }
 0x263   : > { %v1432_v62 = vpop.f32.mrb[24].mxu1 }
 0x264   : > { %v1602_v3 = vmul.f32 %v1598_v58, %v1432_v62  ;;  %v2768_v4 = vpop.f32.mrb[25].mxu1  ;;  %2785 = vmatmul.mubr.msk.bf16.vlgmr.msra.gmra.mrb[32].mxu0 %vm1345_vm4, %v1605_v60 }
 0x265   : > { %2795 = vmatpush3.bf16.msra.mxu0 %v1710_v5  ;;  %v1435_v6 = vpop.f32.mrb[26].mxu1  ;;  %2796 = vmatprep.mubr.msk.bf16.mxu0 %vm3069_vm0, %v3068_v1 }
 0x266   : > { %v1606_v9 = vpack.c.bf16 %v1602_v3, %v1602_v3  ;;  %v2769_v11 = vpop.f32.mrb[27].mxu1  ;;  %2806 = vmatprep.subr.bf16.mxu0 %v3068_v1 }
 0x267   : > { %v1478_v12 = vpop.f32.mrb[28].mxu0 }
 0x268   : > { %v1603_v15 = vmul.f32 %v1599_v13, %v1478_v12  ;;  %v2774_v63 = vpop.f32.mrb[29].mxu0  ;;  %2791 = vmatmul.mubr.msk.bf16.vlgmr.msra.gmra.mrb[32].mxu1 %vm1345_vm4, %v1606_v9 }
 0x269   : > { %2801 = vmatpush3.bf16.msra.mxu1 %v1756_v16  ;;  %v1481_v17 = vpop.f32.mrb[30].mxu0  ;;  %2802 = vmatprep.mubr.msk.bf16.mxu1 %vm3069_vm0, %v3068_v1 }
 0x26a   : > { %v1607_v18 = vpack.c.bf16 %v1603_v15, %v1603_v15  ;;  %v2775_v2 = vpop.f32.mrb[31].mxu0  ;;  %2814 = vmatprep.subr.bf16.mxu1 %v3068_v1 }
 0x26b   : > { %v1524_v19 = vpop.f32.mrb[28].mxu1 }
 0x26c   : > { %v1604_v21 = vmul.f32 %v1600_v20, %v1524_v19  ;;  %v2780_v23 = vpop.f32.mrb[29].mxu1  ;;  %2797 = vmatmul.mubr.msk.bf16.vlgmr.msra.gmra.mrb[36].mxu0 %vm1345_vm4, %v1607_v18 }
 0x26d   : > { %v1527_v24 = vpop.f32.mrb[30].mxu1  ;;  %2810 = vmatprep.mubr.msk.bf16.mxu0 %vm3069_vm0, %v3068_v1  ;;  %2807 = vmatpush3.bf16.msra.mxu0 %v2948_v26 }
 0x26e   : > { %v1608_v25 = vpack.c.bf16 %v1604_v21, %v1604_v21  ;;  %v2781_v8 = vpop.f32.mrb[31].mxu1  ;;  %2808 = vmatprep.subr.bf16.mxu0 %v3068_v1 }
 0x270   : > { %2803 = vmatmul.mubr.msk.bf16.vlgmr.msra.gmra.mrb[36].mxu1 %vm1345_vm4, %v1608_v25 }
 0x271   : > { %2818 = vmatprep.mubr.msk.bf16.mxu1 %vm3069_vm0, %v3068_v1  ;;  %2815 = vmatpush3.bf16.msra.mxu1 %v2949_v29  ;;  %v2175_v29 = vld [vmem:[%s3708_s6] sm:$0xf] }
 0x272   : > { %2816 = vmatprep.subr.bf16.mxu1 %v3068_v1  ;;  %2809 = vmatpush3.bf16.msra.mxu0 %v2950_v30  ;;  %v2183_v30 = vsel %vm1616_vm5, %v2175_v29, 0 }
 0x273   : > { %2822 = vmatprep.subr.bf16.mxu0 %v3068_v1 }
 0x275   : > { %2817 = vmatpush3.bf16.msra.mxu1 %v2951_v31  ;;  %2811 = vmatmul.mubr.msk.bf16.vlgmr.msra.gmra.mrb[40].mxu0 %vm573_vm1, %v3327_v22  ;;  %v2176_v31 = vld [vmem:[%s3708_s6 + $0x4] sm:$0xf] }
 0x276   : > { %2830 = vmatprep.subr.bf16.mxu1 %v3068_v1  ;;  %2823 = vmatpush3.bf16.msra.mxu0 %v2952_v32  ;;  %v2229_v32 = vsel %vm1616_vm5, %v2176_v31, 0 }
 0x277   : > { %2824 = vmatprep.subr.bf16.mxu0 %v3068_v1  ;;  %2826 = vmatprep.mubr.msk.bf16.mxu0 %vm3069_vm0, %v3068_v1 }
 0x278   : > { %2819 = vmatmul.mubr.msk.bf16.vlgmr.msra.gmra.mrb[40].mxu1 %vm573_vm1, %v3327_v22 }
 0x279   : > { %2831 = vmatpush3.bf16.msra.mxu1 %v2953_v33  ;;  %2834 = vmatprep.mubr.msk.bf16.mxu1 %vm3069_vm0, %v3068_v1 }
 0x27a   : > { %2832 = vmatprep.subr.bf16.mxu1 %v3068_v1  ;;  %2825 = vmatpush3.bf16.msra.mxu0 %v2954_v10 }
 0x27b   : > { %2838 = vmatprep.subr.bf16.mxu0 %v3068_v1 }
 0x27d   : > { %2833 = vmatpush3.bf16.msra.mxu1 %v2955_v34  ;;  %2827 = vmatmul.mubr.msk.bf16.vlgmr.msra.gmra.mrb[44].mxu0 %vm573_vm1, %v3327_v22 }
 0x27e   : > { %2844 = vmatprep.subr.bf16.mxu1 %v3068_v1  ;;  %2840 = vmatprep.mubr.msk.bf16.mxu0 %vm3069_vm0, %v3068_v1 }
 0x27f   : > { %2839 = vmatpush3.bf16.msra.mxu0 %v2183_v30 }
 0x280   : > { %2835 = vmatmul.mubr.msk.bf16.vlgmr.msra.gmra.mrb[44].mxu1 %vm573_vm1, %v3327_v22  ;;  %2850 = vmatprep.subr.bf16.mxu0 %v3068_v1 }
 0x281   : > { %2846 = vmatprep.mubr.msk.bf16.mxu1 %vm3069_vm0, %v3068_v1  ;;  %2845 = vmatpush3.bf16.msra.mxu1 %v2229_v32 }
 0x282   : > { %2856 = vmatprep.subr.bf16.mxu1 %v3068_v1 }
 0x337   : > { %v1654_v36 = vpop.f32.mrb[32].mxu0 }
 0x338   : > { %v2786_v38 = vpop.f32.mrb[33].mxu0  ;;  %v1798_v39 = vsel %vm1345_vm4, %v1654_v36, 0.0 }
 0x339   : > { %1799 = vadd.xlane.f32.xlu1 %v1798_v39  ;;  %v1657_v40 = vpop.f32.mrb[34].mxu0 }
 0x33a   : > { %v2787_v41 = vpop.f32.mrb[35].mxu0 }
 0x33b   : > { %v1700_v42 = vpop.f32.mrb[32].mxu1 }
 0x33c   : > { %v2792_v43 = vpop.f32.mrb[33].mxu1  ;;  %v1801_v44 = vsel %vm1345_vm4, %v1700_v42, 0.0 }
 0x33d   : > { %1802 = vadd.xlane.f32.xlu0 %v1801_v44  ;;  %v1703_v45 = vpop.f32.mrb[34].mxu1 }
 0x33e   : > { %v2793_v22 = vpop.f32.mrb[35].mxu1 }
 0x33f   : > { %v1746_v46 = vpop.f32.mrb[36].mxu0 }
 0x340   : > { %v2798_v27 = vpop.f32.mrb[37].mxu0  ;;  %v1804_v47 = vsel %vm1345_vm4, %v1746_v46, 0.0 }
 0x341   : > { %1805 = vadd.xlane.f32.xlu0 %v1804_v47  ;;  %v1749_v48 = vpop.f32.mrb[38].mxu0 }
 0x342   : > { %v2799_v28 = vpop.f32.mrb[39].mxu0 }
 0x343   : > { %v1792_v49 = vpop.f32.mrb[36].mxu1 }
 0x344   : > { %v2804_v50 = vpop.f32.mrb[37].mxu1  ;;  %v1807_v51 = vsel %vm1345_vm4, %v1792_v49, 0.0 }
 0x345   : > { %v1795_v52 = vpop.f32.mrb[38].mxu1  ;;  %1808 = vadd.xlane.f32.xlu1 %v1807_v51 }
 0x346   : > { %v2805_v35 = vpop.f32.mrb[39].mxu1 }
 0x348   : > { %v3555_v53 = vpop.f32.mrb[40].mxu0 }
 0x349   : > { %v2812_v55 = vpop.f32.mrb[41].mxu0  ;;  %v2578_v33 = vmul.f32 -1.442695, %v3555_v53 }
 0x34a   : > { %v1980_v37 = vpop.f32.mrb[42].mxu0 }
 0x34b   : > { %v3557_v54 = vpop.f32.mrb[40].mxu1  ;;  %v2813_v58 = vpop.f32.mrb[43].mxu0  ;;  %2964 = vpow2.f32 %v2578_v33  ;;  %v2565_v33 = vld [vmem:[%s3715_s13 + $0x3] ss:$0 sm:$0xff] }
 0x34c   : > { %v2820_v56 = vpop.f32.mrb[41].mxu1  ;;  %v2579_v10 = vmul.f32 -1.442695, %v3557_v54 }
 0x34d   : > { %v2032_v57 = vpop.f32.mrb[42].mxu1  ;;  %v2558_v56 = vld [vmem:[%s3714_s12] ss:$0 sm:$0xff] }
 0x34e   : > { %v2821_v59 = vpop.f32.mrb[43].mxu1  ;;  %2966 = vpow2.f32 %v2579_v10 }
 0x34f   : > { %v2562_v59 = vld [vmem:[%s3715_s13] ss:$0 sm:$0xff] }
 0x350   : > { %v3559_v60 = vpop.f32.mrb[44].mxu0 }
 0x351   : > { %v2828_v62 = vpop.f32.mrb[45].mxu0  ;;  %v2580_v34 = vmul.f32 -1.442695, %v3559_v60 }
 0x352   : > { %v2084_v3 = vpop.f32.mrb[46].mxu0 }
 0x353   : > { %v3561_v61 = vpop.f32.mrb[44].mxu1  ;;  %v2829_v5 = vpop.f32.mrb[47].mxu0  ;;  %2968 = vpow2.f32 %v2580_v34  ;;  %v2559_v3 = vld [vmem:[%s3714_s12 + $0x1] ss:$0 sm:$0xff] }
 0x354   : > { %v2836_v0 = vpop.f32.mrb[45].mxu1 }
 0x355   : > { %v2136_v4 = vpop.f32.mrb[46].mxu1  ;;  %v2965_v38 = vpop.eup %2964 }
 0x356   : > { %v2837_v6 = vpop.f32.mrb[47].mxu1 }
 0x358   : > { %v2967_v41 = vpop.eup %2966 }
 0x359   : > { %v2152_v22 = vadd.f32 1.0, %v2967_v41 }
 0x3c6   : > { %v1800_v7 = vpop.xlane.xlu1 %1799 }
 0x3c7   : > { %v1811_v9 = vmul.f32 0.125, %v1800_v7 }
 0x3c9   : > { %v3563_v11 = vsub.f32 %v1654_v36, %v1811_v9  ;;  %v2581_v36 = vmul.f32 -1.442695, %v3561_v61  ;;  %v2177_v9 = vld [vmem:[%s3708_s6 + $0x8] sm:$0xf] }
 0x3ca   : > { %v1803_v12 = vpop.xlane.xlu0 %1802 }
 0x3cb   : > { %v1812_v13 = vmul.f32 0.125, %v1803_v12  ;;  %v1819_v14 = vmul.f32 %v3563_v11, %v3563_v11  ;;  %2970 = vpow2.f32 %v2581_v36 }
 0x3cd   : > { %v3567_v15 = vsub.f32 %v1700_v42, %v1812_v13  ;;  %v1823_v63 = vsel %vm1345_vm4, %v1819_v14, 0.0  ;;  %v2151_v42 = vadd.f32 1.0, %v2965_v38 }
 0x3ce   : > { %1824 = vadd.xlane.f32.xlu0 %v1823_v63  ;;  %v1806_v16 = vpop.xlane.xlu0 %1805 }
 0x3cf   : > { %v1813_v17 = vmul.f32 0.125, %v1806_v16  ;;  %v1820_v18 = vmul.f32 %v3567_v15, %v3567_v15 }
 0x3d1   : > { %v3572_v2 = vsub.f32 %v1746_v46, %v1813_v17  ;;  %v1826_v19 = vsel %vm1345_vm4, %v1820_v18, 0.0  ;;  %v2969_v46 = vpop.eup %2968  ;;  %v2275_v18 = vsel %vm1616_vm5, %v2177_v9, 0 }
 0x3d2   : > { %1827 = vadd.xlane.f32.xlu1 %v1826_v19  ;;  %v1809_v20 = vpop.xlane.xlu1 %1808  ;;  %v2153_v28 = vadd.f32 1.0, %v2969_v46 }
 0x3d3   : > { %v1814_v21 = vmul.f32 0.125, %v1809_v20  ;;  %v1821_v23 = vmul.f32 %v3572_v2, %v3572_v2  ;;  %v2178_v20 = vld [vmem:[%s3708_s6 + $0xc] sm:$0xf] }
 0x3d4   : > { %v2321_v30 = vsel %vm1616_vm5, %v2178_v20, 0 }
 0x3d5   : > { %v3577_v24 = vsub.f32 %v1792_v49, %v1814_v21  ;;  %v1829_v25 = vsel %vm1345_vm4, %v1821_v23, 0.0  ;;  %v2971_v50 = vpop.eup %2970  ;;  %v2564_v21 = vld [vmem:[%s3715_s13 + $0x2] ss:$0 sm:$0xff] }
 0x3d6   : > { %1830 = vadd.xlane.f32.xlu0 %v1829_v25  ;;  %v2154_v55 = vadd.f32 1.0, %v2971_v50 }
 0x3d7   : > { %v1822_v8 = vmul.f32 %v3577_v24, %v3577_v24 }
 0x3d9   : > { %v1832_v26 = vsel %vm1345_vm4, %v1822_v8, 0.0 }
 0x3da   : > { %1833 = vadd.xlane.f32.xlu1 %v1832_v26 }
 0x45b   : > { %v1825_v39 = vpop.xlane.xlu0 %1824 }
 0x45c   : > { %v1835_v40 = vmul.f32 0.125, %v1825_v39 }
 0x45e   : > { %v1839_v43 = vadd.f32 1e-05, %v1835_v40 }
 0x45f   : > { %v1828_v44 = vpop.xlane.xlu1 %1827 }
 0x460   : > { %2972 = vrsqrt.f32 %v1839_v43  ;;  %v1836_v45 = vmul.f32 0.125, %v1828_v44 }
 0x461   : > { %2974 = vrcp.f32 %v2151_v42 }
 0x462   : > { %v1840_v27 = vadd.f32 1e-05, %v1836_v45 }
 0x463   : > { %v1831_v47 = vpop.xlane.xlu0 %1830 }
 0x464   : > { %2976 = vrsqrt.f32 %v1840_v27  ;;  %v1837_v48 = vmul.f32 0.125, %v1831_v47 }
 0x465   : > { %2978 = vrcp.f32 %v2152_v22 }
 0x466   : > { %v1841_v49 = vadd.f32 1e-05, %v1837_v48 }
 0x467   : > { %v1834_v51 = vpop.xlane.xlu1 %1833 }
 0x468   : > { %2980 = vrsqrt.f32 %v1841_v49  ;;  %v1838_v52 = vmul.f32 0.125, %v1834_v51 }
 0x469   : > { %2982 = vrcp.f32 %v2153_v28 }
 0x46a   : > { %v2973_v35 = vpop.eup %2972  ;;  %v1842_v37 = vadd.f32 1e-05, %v1838_v52 }
 0x46b   : > { %v1847_v57 = vmul.f32 %v2973_v35, %v3563_v11  ;;  %v2975_v58 = vpop.eup %2974  ;;  %v2563_v11 = vld [vmem:[%s3715_s13 + $0x1] ss:$0 sm:$0xff] }
 0x46c   : > { %2984 = vrsqrt.f32 %v1842_v37  ;;  %v2163_v5 = vmul.f32 %v2975_v58, %v3555_v53  ;;  %v2560_v53 = vld [vmem:[%s3714_s12 + $0x2] ss:$0 sm:$0xff] }
 0x46d   : > { %v1879_v62 = vmul.f32 %v2558_v56, %v1847_v57  ;;  %2986 = vrcp.f32 %v2154_v55 }
 0x46e   : > { %v2977_v0 = vpop.eup %2976 }
 0x46f   : > { %v2979_v4 = vpop.eup %2978  ;;  %v1848_v6 = vmul.f32 %v2977_v0, %v3567_v15  ;;  %v1911_v7 = vadd.f32 %v2562_v59, %v1879_v62 }
 0x470   : > { %v2164_v63 = vmul.f32 %v2979_v4, %v3557_v54 }
 0x471   : > { %v1880_v12 = vmul.f32 %v2559_v3, %v1848_v6  ;;  %v2167_v13 = vmul.f32 %v2163_v5, %v1911_v7 }
 0x472   : > { %v2981_v14 = vpop.eup %2980 }
 0x473   : > { %v2983_v16 = vpop.eup %2982  ;;  %v1849_v15 = vmul.f32 %v2981_v14, %v3572_v2  ;;  %v2171_v17 = vpack.c.bf16 %v2167_v13, %v2167_v13  ;;  %v1912_v19 = vadd.f32 %v2563_v11, %v1880_v12  ;;  %v2561_v2 = vld [vmem:[%s3714_s12 + $0x3] ss:$0 sm:$0xff] }
 0x474   : > { %v2165_v8 = vmul.f32 %v2983_v16, %v3559_v60 }
 0x475   : > { %v1881_v54 = vmul.f32 %v2560_v53, %v1849_v15  ;;  %2841 = vmatmul.mubr.msk.bf16.vlgmr.msra.gmra.mrb[48].mxu0 %vm1345_vm4, %v2171_v17  ;;  %v2168_v23 = vmul.f32 %v2164_v63, %v1912_v19 }
 0x476   : > { %v2985_v25 = vpop.eup %2984  ;;  %2851 = vmatpush3.bf16.msra.mxu0 %v2275_v18  ;;  %2852 = vmatprep.mubr.msk.bf16.mxu0 %vm3069_vm0, %v3068_v1 }
 0x477   : > { %v1850_v26 = vmul.f32 %v2985_v25, %v3577_v24  ;;  %v2172_v29 = vpack.c.bf16 %v2168_v23, %v2168_v23  ;;  %v1913_v31 = vadd.f32 %v2564_v21, %v1881_v54  ;;  %v2987_v32 = vpop.eup %2986 }
 0x478   : > { %v2166_v24 = vmul.f32 %v2987_v32, %v3561_v61 }
 0x479   : > { %v1882_v60 = vmul.f32 %v2561_v2, %v1850_v26  ;;  %2847 = vmatmul.mubr.msk.bf16.vlgmr.msra.gmra.mrb[48].mxu1 %vm1345_vm4, %v2172_v29  ;;  %v2169_v10 = vmul.f32 %v2165_v8, %v1913_v31 }
 0x47a   : > { %2857 = vmatpush3.bf16.msra.mxu1 %v2321_v30  ;;  %2858 = vmatprep.mubr.msk.bf16.mxu1 %vm3069_vm0, %v3068_v1 }
 0x47b   : > { %v2173_v34 = vpack.c.bf16 %v2169_v10, %v2169_v10  ;;  %v1914_v36 = vadd.f32 %v2565_v33, %v1882_v60 }
 0x47d   : > { %2853 = vmatmul.mubr.msk.bf16.vlgmr.msra.gmra.mrb[52].mxu0 %vm1345_vm4, %v2173_v34  ;;  %v2170_v38 = vmul.f32 %v2166_v24, %v1914_v36 }
 0x47f   : > { %v2174_v39 = vpack.c.bf16 %v2170_v38, %v2170_v38 }
 0x481   : > { %2859 = vmatmul.mubr.msk.bf16.vlgmr.msra.gmra.mrb[52].mxu1 %vm1345_vm4, %v2174_v39 }
 0x548   : > { %v2219_v40 = vpop.f32.mrb[48].mxu0 }
 0x549   : > { %v2842_v41 = vpop.f32.mrb[49].mxu0  ;;  %v2363_v45 = vsel %vm573_vm1, %v2219_v40, 0.0 }
 0x54a   : > { %v2222_v42 = vpop.f32.mrb[50].mxu0 }
 0x54b   : > { %v2843_v43 = vpop.f32.mrb[51].mxu0 }
 0x54c   : > { %v2265_v44 = vpop.f32.mrb[48].mxu1 }
 0x54d   : > { %v2364_v1 = vsel %vm573_vm1, %v2265_v44, 0.0  ;;  %v2848_v61 = vpop.f32.mrb[49].mxu1 }
 0x54e   : > { %v2365_v22 = vadd.f32 %v2364_v1, %v2363_v45  ;;  %v2268_v46 = vpop.f32.mrb[50].mxu1 }
 0x54f   : > { %v2849_v27 = vpop.f32.mrb[51].mxu1 }
 0x550   : > { %v2311_v47 = vpop.f32.mrb[52].mxu0 }
 0x551   : > { %v2366_v48 = vsel %vm573_vm1, %v2311_v47, 0.0  ;;  %v2854_v28 = vpop.f32.mrb[53].mxu0 }
 0x552   : > { %v2367_v49 = vadd.f32 %v2366_v48, %v2365_v22  ;;  %v2314_v50 = vpop.f32.mrb[54].mxu0 }
 0x553   : > { %v2855_v51 = vpop.f32.mrb[55].mxu0 }
 0x554   : > { %v2357_v52 = vpop.f32.mrb[52].mxu1 }
 0x555   : > { %v2368_v35 = vsel %vm573_vm1, %v2357_v52, 0.0  ;;  %v2860_v55 = vpop.f32.mrb[53].mxu1 }
 0x556   : > { %v2369_v56 = vadd.f32 %v2368_v35, %v2367_v49  ;;  %v2360_v37 = vpop.f32.mrb[54].mxu1 }
 0x557   : > { %v2861_v57 = vpop.f32.mrb[55].mxu1 }
 0x558   : > { %2370 = vst.msk [vmem:[%s519_s24] sm:$0xff] %vm573_vm1, %v2369_v56 }
 0x559   : > { %3001 = shalt.err (!%p2998_p5)
}
 0x55a   : > { %s3002_s26 = scalar_lea.hbm %s3654_s28, 128  ;;  %s3006_s0 = scalar_lea.hbm %s3716_s14, 256 }
 0x55b   : > { %p3003_p6 = scmp.ne.s32.totalorder %s3654_s28, %s3002_s26  ;;  %p3007_p10 = scmp.lt.u32.totalorder %s3654_s28, %s3716_s14 }
 0x55c   : > { %p3008_p11 = scmp.lt.u32.totalorder %s3006_s0, %s3002_s26  ;;  %p3010_p13 = scmp.lt.u32.totalorder %s3002_s26, %s3654_s28 }
 0x55d   : > { %p3004_p7 = pnand %p3003_p6, %p3189_p4 }
 0x55e   : > { %p3009_p12 = por %p3008_p11, %p3007_p10 }
 0x55f   : > { %p3005_p9 = pneg %p3004_p7 }
 0x560   : > { %p3011_p0 = por %p3010_p13, %p3009_p12 }
 0x562   : > { %p3012_p1 = pnand %p3011_p0, %p3005_p9 }
 0x564   : > { %3015 = shalt.err (!%p3012_p1)
}
 0x565   : > { %2862 = dma.vmem_to_hbm [thread:$0]  (%p3189_p4), %s3656_s27, 128, %s3654_s28, %s2372_s16  }
 0x566 PF: > { %p2868_p2 = scmp.ge.s32.totalorder %s3066_s18, 2  ;;  %s2398_s17 = sand.u32 1, %s3046_s29  }
 0x567   : > { %s2399_s19 = scalar_lea.sflag [#allocation5], %s2398_s17 }
 0x568   : > { %p2865_p3 = pnand %p2868_p2, %p3196_p8 }
 0x56a   : > { %3041 = dma.done.wait (!%p2865_p3), %s2399_s19, 128  }
 0x56b   : > { %3043 = vsyncadd (!%p2865_p3), %s2399_s19, 4294967168  ;;  %s27_s18 = sadd.s32 1, %s3066_s18   ;;  %s3728_s23 = sld [smem:[#allocation9_spill]] }
 0x56c   : > { %p24_p5 = scmp.ge.s32.totalorder %s27_s18, 4   ;;  %s3729_s16 = sld [smem:[#allocation7_spill]] }
 0x56d   : > { %s3730_s17 = sld [smem:[#allocation8_spill]]  ;;  %s3731_s29 = smov %s3050_s30 }
 0x56e   : > { %s3732_s30 = smov %s3054_s15  ;;  %26 = sbr.rel (!%p24_p5) target bundleno = 6 (0x6), region = 124 }
 0x571   : > { %s3733_s15 = smov %s3728_s23 }
 0x575   :  { %2404 = vsyncpa [#allocation5], 1 }
 0x576   :  { %2406 = vsyncpa [#allocation5 + $0x1], 1 }

</bundles_post_ra>
